<compile_context>
chip_gen: v7x
topology: tpu7x:2x2x1
jax: 0.10.0
libtpu: 0.0.40
codegen_flags: <defaults>
</compile_context>

<pallas_src>
import jax
import jax.numpy as jnp
from jax.experimental import pallas as pl
from jax.experimental.pallas import tpu as pltpu

TEXT_DIM = 768
IMG_DIM = 512
HIDDEN = 256
NUM_CLASSES = 4
PAD_CLASSES = 128  # lane-dense classifier output (sliced back to NUM_CLASSES outside)


def _round_up(x, m):
    return -(-x // m) * m


def _pick_batch_tile(B, block_b):
    """Pick (tb, Bp) minimizing padded rows while keeping tb a multiple of 8.

    n_tiles = ceil(B / block_b); tb = round_up(ceil(B / n_tiles), 8).
    This avoids the pathological case where B slightly above the tile size
    nearly doubles the padded work (e.g. B=264 with a 256 tile).
    On v5e, rounding tb further up to a multiple of 128 can help MXU occupancy
    for very large B, but it costs extra padded rows on v6e/v7x, so we keep 8.
    """
    n_tiles = max(1, -(-B // block_b))
    tb = _round_up(-(-B // n_tiles), 8)
    return tb, n_tiles * tb


def mmlnb_head_kernel(
    text_ref,   # (TB, 768) bf16 activation tile
    img_ref,    # (TB, 512) bf16 activation tile
    w1t_ref,    # (768, 256) bf16 : first 768 rows of confidence_net Linear(1280->256)
    w1i_ref,    # (512, 256) bf16 : last 512 rows  of confidence_net Linear(1280->256)
    b1_ref,     # (1, 256)   f32
    w2r_ref,    # (1, 256)   f32  : confidence_net Linear(256->1) weight, as a row
    b2_ref,     # (1, 1)     f32  : scalar in SMEM
    wr_ref,     # (512, 768) bf16 : res_fusion Linear(512->768)
    br_ref,     # (1, 768)   f32
    wc_ref,     # (768, 128) bf16 : classifier Linear(768->C), zero-padded to 128 lanes
    bc_ref,     # (1, 128)   f32  : zero-padded bias
    out_ref,    # (TB, 128)  f32
):
    text_bf = text_ref[...]
    img_bf = img_ref[...]

    # confidence_net layer 1 on concat([text, img], dim=1):
    #   concat(t, i) @ W1 == t @ W1[:768] + i @ W1[768:]
    h = (
        jnp.dot(text_bf, w1t_ref[...], preferred_element_type=jnp.float32)
        + jnp.dot(img_bf, w1i_ref[...], preferred_element_type=jnp.float32)
        + b1_ref[...]
    )
    h = jnp.maximum(h, 0.0)  # ReLU

    # confidence_net layer 2: N=1 matmul replaced by VPU multiply + row reduce,
    # sigmoid via EUP exp + approximate reciprocal.
    logit = jnp.sum(h * w2r_ref[...], axis=-1, keepdims=True) + b2_ref[0, 0]
    conf = pl.reciprocal(1.0 + jnp.exp(-logit), approx=True)  # (TB, 1)

    # res_fusion: img -> 768 (f32 accumulation)
    img_proj = (
        jnp.dot(img_bf, wr_ref[...], preferred_element_type=jnp.float32) + br_ref[...]
    )

    # noise-robust fusion in f32:
    #   conf*text + (1-conf)*img_proj  ==  img_proj + conf*(text - img_proj)
    text_f32 = text_bf.astype(jnp.float32)
    fused = img_proj + conf * (text_f32 - img_proj)  # (TB, 768)

    # classifier: ReLU -> (Dropout: identity in eval) -> Linear(768 -> C, padded to 128)
    act = jnp.maximum(fused, 0.0).astype(jnp.bfloat16)
    out_ref[...] = (
        jnp.dot(act, wc_ref[...], preferred_element_type=jnp.float32) + bc_ref[...]
    )


def _resident_weight_spec(shape):
    # Constant block index -> weight fetched once; request single-buffering so the
    # pipeline does not allocate a second, never-used copy (v7x VMEM headroom).
    idx = lambda i: (0, 0)
    try:
        return pl.BlockSpec(shape, idx, pipeline_mode=pl.Buffered(1))
    except TypeError:
        return pl.BlockSpec(shape, idx)


def mmlnb_head(text_feat, img_feat, params, *, block_b=512):
    B = text_feat.shape[0]
    tb, Bp = _pick_batch_tile(B, block_b)

    # Stream activations as bf16 (halves HBM traffic; the kernel is HBM-bound at
    # f32 on v6e and borderline on v7x).
    text_bf = text_feat.astype(jnp.bfloat16)
    img_bf = img_feat.astype(jnp.bfloat16)
    if Bp != B:
        pad = Bp - B
        text_bf = jnp.pad(text_bf, ((0, pad), (0, 0)))
        img_bf = jnp.pad(img_bf, ((0, pad), (0, 0)))

    grid = (Bp // tb,)

    # Activations tile over batch; weights stay resident (constant block index).
    text_spec = pl.BlockSpec((tb, TEXT_DIM), lambda i: (i, 0))
    img_spec = pl.BlockSpec((tb, IMG_DIM), lambda i: (i, 0))
    out_spec = pl.BlockSpec((tb, PAD_CLASSES), lambda i: (i, 0))

    flops = 2 * Bp * (
        TEXT_DIM * HIDDEN + IMG_DIM * HIDDEN + IMG_DIM * TEXT_DIM + TEXT_DIM * PAD_CLASSES
    )
    weight_bytes = 2 * (
        TEXT_DIM * HIDDEN + IMG_DIM * HIDDEN + IMG_DIM * TEXT_DIM + TEXT_DIM * PAD_CLASSES
    )
    act_bytes = Bp * (2 * (TEXT_DIM + IMG_DIM) + 4 * PAD_CLASSES)
    cost = pl.CostEstimate(
        flops=int(flops),
        transcendentals=int(Bp),
        bytes_accessed=int(weight_bytes + act_bytes),
    )

    out = pl.pallas_call(
        mmlnb_head_kernel,
        out_shape=jax.ShapeDtypeStruct((Bp, PAD_CLASSES), jnp.float32),
        grid=grid,
        in_specs=[
            text_spec,
            img_spec,
            _resident_weight_spec((TEXT_DIM, HIDDEN)),           # w1t
            _resident_weight_spec((IMG_DIM, HIDDEN)),            # w1i
            _resident_weight_spec((1, HIDDEN)),                  # b1
            _resident_weight_spec((1, HIDDEN)),                  # w2_row
            pl.BlockSpec(memory_space=pltpu.MemorySpace.SMEM),   # b2 scalar
            _resident_weight_spec((IMG_DIM, TEXT_DIM)),          # wr
            _resident_weight_spec((1, TEXT_DIM)),                # br
            _resident_weight_spec((TEXT_DIM, PAD_CLASSES)),      # wc_pad
            _resident_weight_spec((1, PAD_CLASSES)),             # bc_pad
        ],
        out_specs=out_spec,
        compiler_params=pltpu.CompilerParams(
            dimension_semantics=("parallel",),
            vmem_limit_bytes=32 << 20,
        ),
        cost_estimate=cost,
    )(
        text_bf,
        img_bf,
        params["w1t"],
        params["w1i"],
        params["b1"],
        params["w2_row"],
        params["b2"],
        params["wr"],
        params["br"],
        params["wc_pad"],
        params["bc_pad"],
    )
    # Padded batch rows hold junk; always slice back to the logical batch.
    return out[:B, :NUM_CLASSES]


def init_params(key):
    ks = jax.random.split(key, 8)
    scale = 0.02
    # Stored already transposed to (in, out) so the kernel does x @ W + b,
    # matching PyTorch's y = x @ W.T + b.
    w1 = scale * jax.random.normal(ks[0], (TEXT_DIM + IMG_DIM, HIDDEN), jnp.float32)
    b1 = scale * jax.random.normal(ks[1], (1, HIDDEN), jnp.float32)
    w2 = scale * jax.random.normal(ks[2], (HIDDEN, 1), jnp.float32)
    b2 = scale * jax.random.normal(ks[3], (1, 1), jnp.float32)
    wr = scale * jax.random.normal(ks[4], (IMG_DIM, TEXT_DIM), jnp.float32)
    br = scale * jax.random.normal(ks[5], (1, TEXT_DIM), jnp.float32)
    wc = scale * jax.random.normal(ks[6], (TEXT_DIM, NUM_CLASSES), jnp.float32)
    bc = scale * jax.random.normal(ks[7], (1, NUM_CLASSES), jnp.float32)

    # f32 master copies (for the reference implementation)
    master = {"w1": w1, "b1": b1, "w2": w2, "b2": b2, "wr": wr, "br": br, "wc": wc, "bc": bc}

    wc_pad = jnp.zeros((TEXT_DIM, PAD_CLASSES), jnp.float32).at[:, :NUM_CLASSES].set(wc)
    bc_pad = jnp.zeros((1, PAD_CLASSES), jnp.float32).at[:, :NUM_CLASSES].set(bc)

    kernel_params = {
        # Large matrices in bf16 (halved HBM traffic, native MXU path);
        # accumulation stays f32 via preferred_element_type.
        "w1t": w1[:TEXT_DIM, :].astype(jnp.bfloat16),   # (768, 256)
        "w1i": w1[TEXT_DIM:, :].astype(jnp.bfloat16),   # (512, 256)
        "b1": b1,                                       # (1, 256) f32
        "w2_row": w2.T,                                 # (1, 256) f32 (VPU reduce path)
        "b2": b2,                                       # (1, 1)   f32 scalar (SMEM)
        "wr": wr.astype(jnp.bfloat16),                  # (512, 768)
        "br": br,                                       # (1, 768) f32
        "wc_pad": wc_pad.astype(jnp.bfloat16),          # (768, 128)
        "bc_pad": bc_pad,                               # (1, 128) f32
    }
    return kernel_params, master


def reference(text_feat, img_feat, m):
    combined = jnp.concatenate([text_feat, img_feat], axis=1)
    h = jnp.maximum(combined @ m["w1"] + m["b1"], 0.0)
    conf = jax.nn.sigmoid(h @ m["w2"] + m["b2"])
    img_proj = img_feat @ m["wr"] + m["br"]
    fused = conf * text_feat + (1.0 - conf) * img_proj
    act = jnp.maximum(fused, 0.0)
    return act @ m["wc"] + m["bc"]


if __name__ == "__main__":
    key = jax.random.PRNGKey(0)
    kp, kt, ki = jax.random.split(key, 3)
    B = 8
    kernel_params, master = init_params(kp)
    text_feat = jax.random.normal(kt, (B, TEXT_DIM), jnp.float32)
    img_feat = jax.random.normal(ki, (B, IMG_DIM), jnp.float32)

    out = mmlnb_head(text_feat, img_feat, kernel_params)
    out = jax.block_until_ready(out)

    ref = reference(text_feat, img_feat, master)
    assert out.shape == (B, NUM_CLASSES)
    # bf16 weights/activations in the kernel vs f32 reference -> looser tolerance
    assert jnp.allclose(out, ref, atol=1e-2, rtol=5e-2), float(jnp.max(jnp.abs(out - ref)))

    print("KERNEL_OK")
</pallas_src>

<mosaic_0001>
module attributes {stable_mosaic.version = 11 : i64} {
  func.func @mmlnb_head_kernel(%arg0: i32, %arg1: memref<8x768xbf16, #tpu.memory_space<vmem>>, %arg2: memref<8x512xbf16, #tpu.memory_space<vmem>>, %arg3: memref<768x256xbf16, #tpu.memory_space<vmem>>, %arg4: memref<512x256xbf16, #tpu.memory_space<vmem>>, %arg5: memref<1x256xf32, #tpu.memory_space<vmem>>, %arg6: memref<1x256xf32, #tpu.memory_space<vmem>>, %arg7: memref<1x1xf32, #tpu.memory_space<smem>>, %arg8: memref<512x768xbf16, #tpu.memory_space<vmem>>, %arg9: memref<1x768xf32, #tpu.memory_space<vmem>>, %arg10: memref<768x128xbf16, #tpu.memory_space<vmem>>, %arg11: memref<1x128xf32, #tpu.memory_space<vmem>>, %arg12: memref<8x128xf32, #tpu.memory_space<vmem>>) attributes {dimension_semantics = [#tpu.dimension_semantics<parallel>], iteration_bounds = array<i64: 1>, scalar_prefetch = 0 : i64, scratch_operands = 0 : i64, tpu.core_type = #tpu.core_type<tc>, window_params = [{transform_indices = @transform_0, window_bounds = array<i64: 8, 768>}, {transform_indices = @transform_1, window_bounds = array<i64: 8, 512>}, {pipeline_mode = #tpu.pipeline_mode<synchronous>, transform_indices = @transform_2, window_bounds = array<i64: 768, 256>}, {pipeline_mode = #tpu.pipeline_mode<synchronous>, transform_indices = @transform_3, window_bounds = array<i64: 512, 256>}, {pipeline_mode = #tpu.pipeline_mode<synchronous>, transform_indices = @transform_4, window_bounds = array<i64: 1, 256>}, {pipeline_mode = #tpu.pipeline_mode<synchronous>, transform_indices = @transform_5, window_bounds = array<i64: 1, 256>}, {transform_indices = @transform_6, window_bounds = array<i64: 1, 1>}, {pipeline_mode = #tpu.pipeline_mode<synchronous>, transform_indices = @transform_7, window_bounds = array<i64: 512, 768>}, {pipeline_mode = #tpu.pipeline_mode<synchronous>, transform_indices = @transform_8, window_bounds = array<i64: 1, 768>}, {pipeline_mode = #tpu.pipeline_mode<synchronous>, transform_indices = @transform_9, window_bounds = array<i64: 768, 128>}, {pipeline_mode = #tpu.pipeline_mode<synchronous>, transform_indices = @transform_10, window_bounds = array<i64: 1, 128>}, {transform_indices = @transform_11, window_bounds = array<i64: 8, 128>}]} {
    %c0 = arith.constant 0 : index
    %c0_0 = arith.constant 0 : index
    %0 = vector.load %arg1[%c0, %c0_0] : memref<8x768xbf16, #tpu.memory_space<vmem>>, vector<8x768xbf16>
    %c0_1 = arith.constant 0 : index
    %c0_2 = arith.constant 0 : index
    %1 = vector.load %arg2[%c0_1, %c0_2] : memref<8x512xbf16, #tpu.memory_space<vmem>>, vector<8x512xbf16>
    %c0_3 = arith.constant 0 : index
    %c0_4 = arith.constant 0 : index
    %2 = vector.load %arg3[%c0_3, %c0_4] : memref<768x256xbf16, #tpu.memory_space<vmem>>, vector<768x256xbf16>
    %cst = arith.constant dense<0.000000e+00> : vector<8x256xf32>
    %3 = tpu.matmul %0, %2, %cst {dimension_numbers = #tpu.dot_dimension_numbers<[1], [0], [0], [1], [0, 0, 1, 1], [], []>} : vector<8x768xbf16>, vector<768x256xbf16>, vector<8x256xf32> -> vector<8x256xf32>
    %c0_5 = arith.constant 0 : index
    %c0_6 = arith.constant 0 : index
    %4 = vector.load %arg4[%c0_5, %c0_6] : memref<512x256xbf16, #tpu.memory_space<vmem>>, vector<512x256xbf16>
    %cst_7 = arith.constant dense<0.000000e+00> : vector<8x256xf32>
    %5 = tpu.matmul %1, %4, %cst_7 {dimension_numbers = #tpu.dot_dimension_numbers<[1], [0], [0], [1], [0, 0, 1, 1], [], []>} : vector<8x512xbf16>, vector<512x256xbf16>, vector<8x256xf32> -> vector<8x256xf32>
    %6 = arith.addf %3, %5 : vector<8x256xf32>
    %c0_8 = arith.constant 0 : index
    %c0_9 = arith.constant 0 : index
    %7 = vector.load %arg5[%c0_8, %c0_9] : memref<1x256xf32, #tpu.memory_space<vmem>>, vector<1x256xf32>
    %8 = vector.broadcast %7 : vector<1x256xf32> to vector<8x256xf32>
    %9 = arith.addf %6, %8 : vector<8x256xf32>
    %cst_10 = arith.constant 0.000000e+00 : f32
    %10 = vector.broadcast %cst_10 : f32 to vector<8x256xf32>
    %11 = arith.maximumf %9, %10 : vector<8x256xf32>
    %c0_11 = arith.constant 0 : index
    %c0_12 = arith.constant 0 : index
    %12 = vector.load %arg6[%c0_11, %c0_12] : memref<1x256xf32, #tpu.memory_space<vmem>>, vector<1x256xf32>
    %13 = vector.broadcast %12 : vector<1x256xf32> to vector<8x256xf32>
    %14 = arith.mulf %11, %13 : vector<8x256xf32>
    %cst_13 = arith.constant dense<0.000000e+00> : vector<8xf32>
    %15 = vector.multi_reduction <add>, %14, %cst_13 [1] : vector<8x256xf32> to vector<8xf32>
    %16 = vector.shape_cast %15 : vector<8xf32> to vector<8x1xf32>
    %c0_14 = arith.constant 0 : index
    %c0_15 = arith.constant 0 : index
    %17 = memref.load %arg7[%c0_14, %c0_15] : memref<1x1xf32, #tpu.memory_space<smem>>
    %18 = vector.broadcast %17 : f32 to vector<8x1xf32>
    %19 = arith.addf %16, %18 : vector<8x1xf32>
    %cst_16 = arith.constant 0.000000e+00 : f32
    %20 = vector.broadcast %cst_16 : f32 to vector<8x1xf32>
    %21 = arith.subf %20, %19 : vector<8x1xf32>
    %22 = math.exp %21 : vector<8x1xf32>
    %cst_17 = arith.constant 1.000000e+00 : f32
    %23 = vector.broadcast %cst_17 : f32 to vector<8x1xf32>
    %24 = arith.addf %23, %22 : vector<8x1xf32>
    %25 = tpu.reciprocal %24 {approx = true} : vector<8x1xf32> -> vector<8x1xf32>
    %c0_18 = arith.constant 0 : index
    %c0_19 = arith.constant 0 : index
    %26 = vector.load %arg8[%c0_18, %c0_19] : memref<512x768xbf16, #tpu.memory_space<vmem>>, vector<512x768xbf16>
    %cst_20 = arith.constant dense<0.000000e+00> : vector<8x768xf32>
    %27 = tpu.matmul %1, %26, %cst_20 {dimension_numbers = #tpu.dot_dimension_numbers<[1], [0], [0], [1], [0, 0, 1, 1], [], []>} : vector<8x512xbf16>, vector<512x768xbf16>, vector<8x768xf32> -> vector<8x768xf32>
    %c0_21 = arith.constant 0 : index
    %c0_22 = arith.constant 0 : index
    %28 = vector.load %arg9[%c0_21, %c0_22] : memref<1x768xf32, #tpu.memory_space<vmem>>, vector<1x768xf32>
    %29 = vector.broadcast %28 : vector<1x768xf32> to vector<8x768xf32>
    %30 = arith.addf %27, %29 : vector<8x768xf32>
    %31 = arith.extf %0 : vector<8x768xbf16> to vector<8x768xf32>
    %32 = arith.subf %31, %30 : vector<8x768xf32>
    %33 = vector.broadcast %25 : vector<8x1xf32> to vector<8x768xf32>
    %34 = arith.mulf %33, %32 : vector<8x768xf32>
    %35 = arith.addf %30, %34 : vector<8x768xf32>
    %cst_23 = arith.constant 0.000000e+00 : f32
    %36 = vector.broadcast %cst_23 : f32 to vector<8x768xf32>
    %37 = arith.maximumf %35, %36 : vector<8x768xf32>
    %38 = arith.truncf %37 : vector<8x768xf32> to vector<8x768xbf16>
    %c0_24 = arith.constant 0 : index
    %c0_25 = arith.constant 0 : index
    %39 = vector.load %arg10[%c0_24, %c0_25] : memref<768x128xbf16, #tpu.memory_space<vmem>>, vector<768x128xbf16>
    %cst_26 = arith.constant dense<0.000000e+00> : vector<8x128xf32>
    %40 = tpu.matmul %38, %39, %cst_26 {dimension_numbers = #tpu.dot_dimension_numbers<[1], [0], [0], [1], [0, 0, 1, 1], [], []>} : vector<8x768xbf16>, vector<768x128xbf16>, vector<8x128xf32> -> vector<8x128xf32>
    %c0_27 = arith.constant 0 : index
    %c0_28 = arith.constant 0 : index
    %41 = vector.load %arg11[%c0_27, %c0_28] : memref<1x128xf32, #tpu.memory_space<vmem>>, vector<1x128xf32>
    %42 = vector.broadcast %41 : vector<1x128xf32> to vector<8x128xf32>
    %43 = arith.addf %40, %42 : vector<8x128xf32>
    %c0_29 = arith.constant 0 : index
    %c0_30 = arith.constant 0 : index
    %44 = vector.load %arg12[%c0_29, %c0_30] : memref<8x128xf32, #tpu.memory_space<vmem>>, vector<8x128xf32>
    tpu.vector_store %arg12[%c0_29, %c0_30], %43 {strides = array<i32>} : memref<8x128xf32, #tpu.memory_space<vmem>>, vector<8x128xf32>,
    return
  }
  func.func @transform_0(%arg0: i32) -> (i32, i32) {
    %c0_i32 = arith.constant 0 : i32
    %c0_i32_0 = arith.constant 0 : i32
    return %arg0, %c0_i32 : i32, i32
  }
  func.func @transform_1(%arg0: i32) -> (i32, i32) {
    %c0_i32 = arith.constant 0 : i32
    %c0_i32_0 = arith.constant 0 : i32
    return %arg0, %c0_i32 : i32, i32
  }
  func.func @transform_2(%arg0: i32) -> (i32, i32) {
    %c0_i32 = arith.constant 0 : i32
    %c0_i32_0 = arith.constant 0 : i32
    %c0_i32_1 = arith.constant 0 : i32
    return %c0_i32, %c0_i32_0 : i32, i32
  }
  func.func @transform_3(%arg0: i32) -> (i32, i32) {
    %c0_i32 = arith.constant 0 : i32
    %c0_i32_0 = arith.constant 0 : i32
    %c0_i32_1 = arith.constant 0 : i32
    return %c0_i32, %c0_i32_0 : i32, i32
  }
  func.func @transform_4(%arg0: i32) -> (i32, i32) {
    %c0_i32 = arith.constant 0 : i32
    %c0_i32_0 = arith.constant 0 : i32
    %c0_i32_1 = arith.constant 0 : i32
    return %c0_i32, %c0_i32_0 : i32, i32
  }
  func.func @transform_5(%arg0: i32) -> (i32, i32) {
    %c0_i32 = arith.constant 0 : i32
    %c0_i32_0 = arith.constant 0 : i32
    %c0_i32_1 = arith.constant 0 : i32
    return %c0_i32, %c0_i32_0 : i32, i32
  }
  func.func @transform_6(%arg0: i32) -> (i32, i32) {
    %c0_i32 = arith.constant 0 : i32
    %c0_i32_0 = arith.constant 0 : i32
    %c0_i32_1 = arith.constant 0 : i32
    return %c0_i32, %c0_i32_0 : i32, i32
  }
  func.func @transform_7(%arg0: i32) -> (i32, i32) {
    %c0_i32 = arith.constant 0 : i32
    %c0_i32_0 = arith.constant 0 : i32
    %c0_i32_1 = arith.constant 0 : i32
    return %c0_i32, %c0_i32_0 : i32, i32
  }
  func.func @transform_8(%arg0: i32) -> (i32, i32) {
    %c0_i32 = arith.constant 0 : i32
    %c0_i32_0 = arith.constant 0 : i32
    %c0_i32_1 = arith.constant 0 : i32
    return %c0_i32, %c0_i32_0 : i32, i32
  }
  func.func @transform_9(%arg0: i32) -> (i32, i32) {
    %c0_i32 = arith.constant 0 : i32
    %c0_i32_0 = arith.constant 0 : i32
    %c0_i32_1 = arith.constant 0 : i32
    return %c0_i32, %c0_i32_0 : i32, i32
  }
  func.func @transform_10(%arg0: i32) -> (i32, i32) {
    %c0_i32 = arith.constant 0 : i32
    %c0_i32_0 = arith.constant 0 : i32
    %c0_i32_1 = arith.constant 0 : i32
    return %c0_i32, %c0_i32_0 : i32, i32
  }
  func.func @transform_11(%arg0: i32) -> (i32, i32) {
    %c0_i32 = arith.constant 0 : i32
    %c0_i32_0 = arith.constant 0 : i32
    return %arg0, %c0_i32 : i32, i32
  }
}

</mosaic_0001>

<bundles_post_ra>
// kernel: tpu_custom_call.1
= control target key start
LH: loop header
LB: loop body
LE: loop exit
PB: predicated region body
PF: predicated region fallthrough
CT: control target
= control target key end

     0   :  { %17 = vsyncpa [#allocation4], 0  ;;  %s4874_s0 = inlined_call_operand.hbm [shape: bf16[8,768], index: 0, kind: input, shape index: {}]   ;;  %s4875_s1 = inlined_call_operand.hbm [shape: bf16[8,512], index: 1, kind: input, shape index: {}]   ;;  %s4876_s2 = inlined_call_operand.hbm [shape: bf16[768,256], index: 2, kind: input, shape index: {}]   ;;  %s4877_s3 = inlined_call_operand.hbm [shape: bf16[512,256], index: 3, kind: input, shape index: {}]   ;;  %s4878_s4 = inlined_call_operand.vmem [shape: f32[1,256], index: 4, kind: input, shape index: {}]   ;;  %s4879_s5 = inlined_call_operand.vmem [shape: f32[1,256], index: 5, kind: input, shape index: {}]   ;;  %s4880_s6 = inlined_call_operand.<no memory space> [shape: f32[1,1], index: 6, kind: input, shape index: {}]   ;;  %s4881_s7 = inlined_call_operand.hbm [shape: bf16[512,768], index: 7, kind: input, shape index: {}]   ;;  %s4882_s8 = inlined_call_operand.vmem [shape: f32[1,768], index: 8, kind: input, shape index: {}]   ;;  %s4883_s9 = inlined_call_operand.hbm [shape: bf16[768,128], index: 9, kind: input, shape index: {}]   ;;  %s4884_s10 = inlined_call_operand.vmem [shape: f32[1,128], index: 10, kind: input, shape index: {}]   ;;  %s4885_s11 = inlined_call_operand.hbm [shape: f32[8,128], index: 11, kind: output, shape index: {}]  }
   0x1   :  { %18 = vsyncpa [#allocation7], 0 }
   0x2   :  { %19 = vsyncpa [#allocation10], 0 }
   0x3   :  { %20 = vsyncpa [#allocation13], 0 }
   0x4   :  { %21 = vsyncpa [#allocation5], 0  ;;  %s4626_s17 = smov [#allocation6]   ;;  %s4462_s21 = scalar_lea.hbm %s4875_s1, 256 }
   0x5   :  { %s38_s18 = sshll.u32 %s4626_s17, 4  ;;  %p4463_p0 = scmp.ne.s32.totalorder %s4875_s1, %s4462_s21  ;;  %s39_s18 = int_to_ptr.vmem [resolvable:$true] %s38_s18 }
   0x6   :  { %p4466_p1 = scmp.lt.u32.totalorder %s4462_s21, %s4875_s1 }
   0x8   :  { %p4468_p2 = pnand %p4466_p1, %p4463_p0 }
   0xa   :  { %4471 = shalt.err (!%p4468_p2)
}
   0xb   :  { %s4472_s26 = scalar_lea.vmem %s39_s18, 256  ;;  %p4477_p4 = scmp.lt.s32.totalorder %s39_s18, %s39_s18 }
   0xc   :  { %p4473_p3 = scmp.ne.s32.totalorder %s39_s18, %s4472_s26  ;;  %p4478_p5 = scmp.lt.s32.totalorder %s4472_s26, %s4472_s26 }
   0xe   :  { %p4479_p6 = por %p4478_p5, %p4477_p4 }
  0x10   :  { %p4480_p7 = pnand %p4479_p6, %p4473_p3 }
  0x12   :  { %4483 = shalt.err (!%p4480_p7)
}
  0x13   :  { %41 = dma.hbm_to_vmem [thread:$0]  %s4875_s1, 256, %s39_s18, [#allocation7]  }
  0x14   :  { %s4627_s29 = smov [#allocation9]   ;;  %s4628_s12 = smov [#allocation3]  }
  0x15   :  { %s59_s30 = sshll.u32 %s4627_s29, 4  ;;  %s28_s13 = sshll.u32 %s4628_s12, 4  ;;  %s60_s30 = int_to_ptr.vmem [resolvable:$true] %s59_s30  ;;  %s29_s13 = int_to_ptr.vmem [resolvable:$true] %s28_s13 }
  0x16   :  { %s4484_s16 = scalar_lea.hbm %s4877_s3, 8192 }
  0x17   :  { %p4485_p8 = scmp.ne.s32.totalorder %s4877_s3, %s4484_s16  ;;  %p4488_p9 = scmp.lt.u32.totalorder %s4484_s16, %s4877_s3 }
  0x19   :  { %p4490_p10 = pnand %p4488_p9, %p4485_p8 }
  0x1b   :  { %4493 = shalt.err (!%p4490_p10)
}
  0x1c   :  { %s4494_s1 = scalar_lea.vmem %s60_s30, 8192  ;;  %p4499_p12 = scmp.lt.s32.totalorder %s60_s30, %s60_s30 }
  0x1d   :  { %p4495_p11 = scmp.ne.s32.totalorder %s60_s30, %s4494_s1  ;;  %p4500_p13 = scmp.lt.s32.totalorder %s4494_s1, %s4494_s1 }
  0x1f   :  { %p4501_p0 = por %p4500_p13, %p4499_p12 }
  0x21   :  { %p4502_p1 = pnand %p4501_p0, %p4495_p11 }
  0x23   :  { %4505 = shalt.err (!%p4502_p1)
}
  0x24   :  { %s4629_s18 = smov 128   ;;  %s4630_s22 = smov 8  }
  0x25   :  { %65 = dma.hbm_to_vmem [thread:$0]  %s4877_s3, 8192, %s60_s30, [#allocation10], %s4629_s18, %s4629_s18, %s4630_s22  }
  0x26   :  { %s4506_s27 = scalar_lea.hbm %s4874_s0, 384 }
  0x27   :  { %p4507_p2 = scmp.ne.s32.totalorder %s4874_s0, %s4506_s27  ;;  %p4510_p3 = scmp.lt.u32.totalorder %s4506_s27, %s4874_s0 }
  0x29   :  { %p4512_p4 = pnand %p4510_p3, %p4507_p2 }
  0x2b   :  { %4515 = shalt.err (!%p4512_p4)
}
  0x2c   :  { %s4516_s15 = scalar_lea.vmem %s29_s13, 384  ;;  %p4521_p6 = scmp.lt.s32.totalorder %s29_s13, %s29_s13 }
  0x2d   :  { %p4517_p5 = scmp.ne.s32.totalorder %s29_s13, %s4516_s15  ;;  %p4522_p7 = scmp.lt.s32.totalorder %s4516_s15, %s4516_s15 }
  0x2f   :  { %p4523_p8 = por %p4522_p7, %p4521_p6 }
  0x31   :  { %p4524_p9 = pnand %p4523_p8, %p4517_p5 }
  0x33   :  { %4527 = shalt.err (!%p4524_p9)
}
  0x34   :  { %31 = dma.hbm_to_vmem [thread:$0]  %s4874_s0, 384, %s29_s13, [#allocation4]  }
  0x35   :  { %s4631_s16 = smov [#allocation8]   ;;  %s4632_s19 = smov [#allocation11]  }
  0x36   :  { %s47_s17 = sshll.u32 %s4631_s16, 4  ;;  %s77_s20 = sshll.u32 %s4632_s19, 4  ;;  %s48_s17 = int_to_ptr.vmem [resolvable:$true] %s47_s17  ;;  %s78_s20 = int_to_ptr.vmem [resolvable:$true] %s77_s20 }
  0x37   :  { %s4528_s23 = scalar_lea.hbm %s4876_s2, 12288 }
  0x38   :  { %p4529_p10 = scmp.ne.s32.totalorder %s4876_s2, %s4528_s23  ;;  %p4532_p11 = scmp.lt.u32.totalorder %s4528_s23, %s4876_s2 }
  0x3a   :  { %p4534_p12 = pnand %p4532_p11, %p4529_p10 }
  0x3c   :  { %4537 = shalt.err (!%p4534_p12)
}
  0x3d   :  { %s4538_s0 = scalar_lea.vmem %s48_s17, 12288  ;;  %p4543_p0 = scmp.lt.s32.totalorder %s48_s17, %s48_s17 }
  0x3e   :  { %p4539_p13 = scmp.ne.s32.totalorder %s48_s17, %s4538_s0  ;;  %p4544_p1 = scmp.lt.s32.totalorder %s4538_s0, %s4538_s0 }
  0x40   :  { %p4545_p2 = por %p4544_p1, %p4543_p0 }
  0x42   :  { %p4546_p3 = pnand %p4545_p2, %p4539_p13 }
  0x44   :  { %4549 = shalt.err (!%p4546_p3)
}
  0x45   :  { %53 = dma.hbm_to_vmem [thread:$0]  %s4876_s2, 12288, %s48_s17, [#allocation7], %s4629_s18, %s4629_s18, %s4630_s22  }
  0x46   :  { %s4550_s14 = scalar_lea.hbm %s4881_s7, 24576 }
  0x47   :  { %p4551_p4 = scmp.ne.s32.totalorder %s4881_s7, %s4550_s14  ;;  %p4554_p5 = scmp.lt.u32.totalorder %s4550_s14, %s4881_s7 }
  0x49   :  { %p4556_p6 = pnand %p4554_p5, %p4551_p4 }
  0x4b   :  { %4559 = shalt.err (!%p4556_p6)
}
  0x4c   :  { %s4560_s19 = scalar_lea.vmem %s78_s20, 24576  ;;  %p4565_p8 = scmp.lt.s32.totalorder %s78_s20, %s78_s20 }
  0x4d   :  { %p4561_p7 = scmp.ne.s32.totalorder %s78_s20, %s4560_s19  ;;  %p4566_p9 = scmp.lt.s32.totalorder %s4560_s19, %s4560_s19 }
  0x4f   :  { %p4567_p10 = por %p4566_p9, %p4565_p8 }
  0x51   :  { %p4568_p11 = pnand %p4567_p10, %p4561_p7 }
  0x53   :  { %4571 = shalt.err (!%p4568_p11)
}
  0x54   :  { %s4633_s2 = smov 384   ;;  %s4634_s18 = smov 24  }
  0x55   :  { %83 = dma.hbm_to_vmem [thread:$0]  %s4881_s7, 24576, %s78_s20, [#allocation10], %s4633_s2, %s4633_s2, %s4634_s18  }
  0x56   :  { %s4635_s21 = smov [#allocation12]   ;;  %s4572_s25 = scalar_lea.hbm %s4883_s9, 6144 }
  0x57   :  { %s91_s1 = sshll.u32 %s4635_s21, 4  ;;  %p4573_p12 = scmp.ne.s32.totalorder %s4883_s9, %s4572_s25  ;;  %s92_s1 = int_to_ptr.vmem [resolvable:$true] %s91_s1 }
  0x58   :  { %p4576_p13 = scmp.lt.u32.totalorder %s4572_s25, %s4883_s9 }
  0x5a   :  { %p4578_p0 = pnand %p4576_p13, %p4573_p12 }
  0x5c   :  { %4581 = shalt.err (!%p4578_p0)
}
  0x5d   :  { %s4582_s28 = scalar_lea.vmem %s92_s1, 6144  ;;  %p4587_p2 = scmp.lt.s32.totalorder %s92_s1, %s92_s1 }
  0x5e   :  { %p4583_p1 = scmp.ne.s32.totalorder %s92_s1, %s4582_s28  ;;  %p4588_p3 = scmp.lt.s32.totalorder %s4582_s28, %s4582_s28 }
  0x60   :  { %p4589_p4 = por %p4588_p3, %p4587_p2 }
  0x62   :  { %p4590_p5 = pnand %p4589_p4, %p4583_p1 }
  0x64   :  { %4593 = shalt.err (!%p4590_p5)
}
  0x65   :  { %s4636_s7 = smov 64   ;;  %s4637_s20 = smov 4  }
  0x66   :  { %97 = dma.hbm_to_vmem [thread:$0]  %s4883_s9, 6144, %s92_s1, [#allocation13], %s4636_s7, %s4636_s7, %s4637_s20  }
  0x67   :  { %4616 = dma.done.wait [#allocation4], 384  }
  0x68   :  { %4617 = vsyncadd [#allocation4], 4294966912 }
  0x69   :  { %4618 = dma.done.wait [#allocation7], 12544  }
  0x6a   :  { %4619 = vsyncadd [#allocation7], 4294954752 }
  0x6b   :  { %4620 = dma.done.wait [#allocation10], 32768  }
  0x6c   :  { %4621 = vsyncadd [#allocation10], 4294934528 }
  0x6d   :  { %4622 = dma.done.wait [#allocation13], 6144  }
  0x6e   :  { %4623 = vsyncadd [#allocation13], 4294961152  ;;  %v3869_v0 = vld [vmem:[#allocation9 + $0x4] ss:$8 sps:$4 sm:$0xff]   ;;  %v3873_v2 = vld [vmem:[#allocation9] ss:$8 sps:$4 sm:$0xff]  }
  0x6f   :  { %v3871_v1 = vld [vmem:[#allocation9 + $0x104] ss:$8 sps:$4 sm:$0xff]   ;;  %618 = vmatprep.subr.bf16.mxu0 %v3869_v0  ;;  %v3874_v3 = vld [vmem:[#allocation9 + $0x100] ss:$8 sps:$4 sm:$0xff]   ;;  %v3875_v4 = vld [vmem:[#allocation9 + $0x14] ss:$8 sps:$4 sm:$0xff]  }
  0x70   :  { %659 = vmatprep.subr.bf16.mxu1 %v3871_v1  ;;  %619 = vmatpush1.bf16.msra.mxu0 %v3873_v2  ;;  %v3877_v5 = vld [vmem:[#allocation9 + $0x114] ss:$8 sps:$4 sm:$0xff]   ;;  %v3879_v6 = vld [vmem:[#allocation9 + $0x10] ss:$8 sps:$4 sm:$0xff]   ;;  %v3881_v8 = vld [vmem:[#allocation9 + $0x24] ss:$8 sps:$4 sm:$0xff]  }
  0x71   :  { %660 = vmatpush1.bf16.msra.mxu1 %v3874_v3  ;;  %620 = vmatprep.subr.bf16.mxu0 %v3875_v4  ;;  %v3880_v7 = vld [vmem:[#allocation9 + $0x110] ss:$8 sps:$4 sm:$0xff]   ;;  %v3883_v9 = vld [vmem:[#allocation9 + $0x124] ss:$8 sps:$4 sm:$0xff]   ;;  %v3885_v10 = vld [vmem:[#allocation9 + $0x20] ss:$8 sps:$4 sm:$0xff]  }
  0x72   :  { %661 = vmatprep.subr.bf16.mxu1 %v3877_v5  ;;  %v3886_v11 = vld [vmem:[#allocation9 + $0x120] ss:$8 sps:$4 sm:$0xff]   ;;  %v3887_v12 = vld [vmem:[#allocation9 + $0x34] ss:$8 sps:$4 sm:$0xff]   ;;  %v3891_v14 = vld [vmem:[#allocation9 + $0x30] ss:$8 sps:$4 sm:$0xff]  }
  0x73   :  { %v3889_v13 = vld [vmem:[#allocation9 + $0x134] ss:$8 sps:$4 sm:$0xff]   ;;  %v3892_v15 = vld [vmem:[#allocation9 + $0x130] ss:$8 sps:$4 sm:$0xff]   ;;  %v3893_v16 = vld [vmem:[#allocation9 + $0x44] ss:$8 sps:$4 sm:$0xff]  }
  0x74   :  { %621 = vmatpush1.bf16.msra.mxu0 %v3879_v6  ;;  %v3895_v17 = vld [vmem:[#allocation9 + $0x144] ss:$8 sps:$4 sm:$0xff]   ;;  %v3897_v18 = vld [vmem:[#allocation9 + $0x40] ss:$8 sps:$4 sm:$0xff]   ;;  %v3899_v20 = vld [vmem:[#allocation9 + $0x54] ss:$8 sps:$4 sm:$0xff]  }
  0x75   :  { %662 = vmatpush1.bf16.msra.mxu1 %v3880_v7  ;;  %622 = vmatprep.subr.bf16.mxu0 %v3881_v8  ;;  %v3898_v19 = vld [vmem:[#allocation9 + $0x140] ss:$8 sps:$4 sm:$0xff]   ;;  %v3901_v21 = vld [vmem:[#allocation9 + $0x154] ss:$8 sps:$4 sm:$0xff]   ;;  %v3903_v22 = vld [vmem:[#allocation9 + $0x50] ss:$8 sps:$4 sm:$0xff]  }
  0x76   :  { %663 = vmatprep.subr.bf16.mxu1 %v3883_v9  ;;  %v3904_v23 = vld [vmem:[#allocation9 + $0x150] ss:$8 sps:$4 sm:$0xff]   ;;  %v3905_v24 = vld [vmem:[#allocation9 + $0x64] ss:$8 sps:$4 sm:$0xff]   ;;  %v3909_v26 = vld [vmem:[#allocation9 + $0x60] ss:$8 sps:$4 sm:$0xff]  }
  0x77   :  { %v3907_v25 = vld [vmem:[#allocation9 + $0x164] ss:$8 sps:$4 sm:$0xff]   ;;  %v3910_v27 = vld [vmem:[#allocation9 + $0x160] ss:$8 sps:$4 sm:$0xff]   ;;  %v3911_v28 = vld [vmem:[#allocation9 + $0x74] ss:$8 sps:$4 sm:$0xff]  }
  0x78   :  { %623 = vmatpush1.bf16.msra.mxu0 %v3885_v10  ;;  %v3913_v29 = vld [vmem:[#allocation9 + $0x174] ss:$8 sps:$4 sm:$0xff]   ;;  %v3915_v30 = vld [vmem:[#allocation9 + $0x70] ss:$8 sps:$4 sm:$0xff]   ;;  %v3917_v32 = vld [vmem:[#allocation9 + $0x84] ss:$8 sps:$4 sm:$0xff]  }
  0x79   :  { %664 = vmatpush1.bf16.msra.mxu1 %v3886_v11  ;;  %624 = vmatprep.subr.bf16.mxu0 %v3887_v12  ;;  %v3916_v31 = vld [vmem:[#allocation9 + $0x170] ss:$8 sps:$4 sm:$0xff]   ;;  %v3919_v33 = vld [vmem:[#allocation9 + $0x184] ss:$8 sps:$4 sm:$0xff]   ;;  %v3921_v34 = vld [vmem:[#allocation9 + $0x80] ss:$8 sps:$4 sm:$0xff]  }
  0x7a   :  { %665 = vmatprep.subr.bf16.mxu1 %v3889_v13  ;;  %v3922_v35 = vld [vmem:[#allocation9 + $0x180] ss:$8 sps:$4 sm:$0xff]   ;;  %v3923_v36 = vld [vmem:[#allocation9 + $0x94] ss:$8 sps:$4 sm:$0xff]   ;;  %v3927_v38 = vld [vmem:[#allocation9 + $0x90] ss:$8 sps:$4 sm:$0xff]  }
  0x7b   :  { %v3925_v37 = vld [vmem:[#allocation9 + $0x194] ss:$8 sps:$4 sm:$0xff]   ;;  %v3928_v39 = vld [vmem:[#allocation9 + $0x190] ss:$8 sps:$4 sm:$0xff]   ;;  %v3929_v40 = vld [vmem:[#allocation9 + $0xa4] ss:$8 sps:$4 sm:$0xff]  }
  0x7c   :  { %625 = vmatpush1.bf16.msra.mxu0 %v3891_v14  ;;  %v3931_v41 = vld [vmem:[#allocation9 + $0x1a4] ss:$8 sps:$4 sm:$0xff]   ;;  %v3933_v42 = vld [vmem:[#allocation9 + $0xa0] ss:$8 sps:$4 sm:$0xff]   ;;  %v3935_v44 = vld [vmem:[#allocation9 + $0xb4] ss:$8 sps:$4 sm:$0xff]  }
  0x7d   :  { %666 = vmatpush1.bf16.msra.mxu1 %v3892_v15  ;;  %626 = vmatprep.subr.bf16.mxu0 %v3893_v16  ;;  %v3934_v43 = vld [vmem:[#allocation9 + $0x1a0] ss:$8 sps:$4 sm:$0xff]   ;;  %v3937_v45 = vld [vmem:[#allocation9 + $0x1b4] ss:$8 sps:$4 sm:$0xff]   ;;  %v3939_v49 = vld [vmem:[#allocation9 + $0xb0] ss:$8 sps:$4 sm:$0xff]  }
  0x7e   :  { %667 = vmatprep.subr.bf16.mxu1 %v3895_v17  ;;  %v122_v46 = vld [vmem:[#allocation6] sm:$0xff]  ;;  %v123_v48 = vld [vmem:[#allocation6 + $0x8] sm:$0xff]  ;;  %v3941_v52 = vld [vmem:[#allocation9 + $0xc4] ss:$8 sps:$4 sm:$0xff]   ;;  %s4638_s19 = smov [#allocation14]  }
  0x7f   :  { %v4777_v47 = vcombine.high %v122_v46, %v122_v46  ;;  %v3940_v50 = vld [vmem:[#allocation9 + $0x1b0] ss:$8 sps:$4 sm:$0xff]   ;;  %v4779_v51 = vcombine.high %v123_v48, %v123_v48  ;;  %v3943_v53 = vld [vmem:[#allocation9 + $0x1c4] ss:$8 sps:$4 sm:$0xff]   ;;  %v3945_v54 = vld [vmem:[#allocation9 + $0xc0] ss:$8 sps:$4 sm:$0xff]   ;;  %v4783_v6 = vcombine.low %v122_v46, %v122_v46  ;;  %v4785_v7 = vcombine.low %v123_v48, %v123_v48 }
  0x80   :  { %627 = vmatpush1.bf16.msra.mxu0 %v3897_v18  ;;  %v3946_v55 = vld [vmem:[#allocation9 + $0x1c0] ss:$8 sps:$4 sm:$0xff]   ;;  %v3947_v56 = vld [vmem:[#allocation9 + $0xd4] ss:$8 sps:$4 sm:$0xff]   ;;  %v3951_v58 = vld [vmem:[#allocation9 + $0xd0] ss:$8 sps:$4 sm:$0xff]  }
  0x81   :  { %668 = vmatpush1.bf16.msra.mxu1 %v3898_v19  ;;  %628 = vmatprep.subr.bf16.mxu0 %v3899_v20  ;;  %v3949_v57 = vld [vmem:[#allocation9 + $0x1d4] ss:$8 sps:$4 sm:$0xff]   ;;  %v3952_v59 = vld [vmem:[#allocation9 + $0x1d0] ss:$8 sps:$4 sm:$0xff]   ;;  %v3953_v60 = vld [vmem:[#allocation9 + $0xe4] ss:$8 sps:$4 sm:$0xff]  }
  0x82   :  { %669 = vmatprep.subr.bf16.mxu1 %v3901_v21  ;;  %650 = vmatprep.mubr.bf16.mxu0 %v4777_v47  ;;  %v3955_v61 = vld [vmem:[#allocation9 + $0x1e4] ss:$8 sps:$4 sm:$0xff]   ;;  %v3957_v62 = vld [vmem:[#allocation9 + $0xe0] ss:$8 sps:$4 sm:$0xff]   ;;  %v3959_v0 = vld [vmem:[#allocation9 + $0xf4] ss:$8 sps:$4 sm:$0xff]  }
  0x83   :  { %691 = vmatprep.mubr.bf16.mxu1 %v4779_v51  ;;  %v3958_v63 = vld [vmem:[#allocation9 + $0x1e0] ss:$8 sps:$4 sm:$0xff]   ;;  %v3961_v1 = vld [vmem:[#allocation9 + $0x1f4] ss:$8 sps:$4 sm:$0xff]   ;;  %v3963_v2 = vld [vmem:[#allocation9 + $0xf0] ss:$8 sps:$4 sm:$0xff]  }
  0x84   :  { %629 = vmatpush1.bf16.msra.mxu0 %v3903_v22  ;;  %v3964_v3 = vld [vmem:[#allocation9 + $0x1f0] ss:$8 sps:$4 sm:$0xff]   ;;  %v3971_v4 = vld [vmem:[#allocation8 + $0x4] ss:$8 sps:$4 sm:$0xff]   ;;  %v3969_v8 = vld [vmem:[#allocation8] ss:$8 sps:$4 sm:$0xff]  }
  0x85   :  { %670 = vmatpush1.bf16.msra.mxu1 %v3904_v23  ;;  %630 = vmatprep.subr.bf16.mxu0 %v3905_v24  ;;  %v3974_v5 = vld [vmem:[#allocation8 + $0x104] ss:$8 sps:$4 sm:$0xff]   ;;  %v3972_v9 = vld [vmem:[#allocation8 + $0x100] ss:$8 sps:$4 sm:$0xff]   ;;  %v3977_v10 = vld [vmem:[#allocation8 + $0x14] ss:$8 sps:$4 sm:$0xff]  }
  0x86   :  { %671 = vmatprep.subr.bf16.mxu1 %v3907_v25  ;;  %v3980_v11 = vld [vmem:[#allocation8 + $0x114] ss:$8 sps:$4 sm:$0xff]   ;;  %v3975_v12 = vld [vmem:[#allocation8 + $0x10] ss:$8 sps:$4 sm:$0xff]   ;;  %v3983_v14 = vld [vmem:[#allocation8 + $0x24] ss:$8 sps:$4 sm:$0xff]  }
  0x87   :  { %v3978_v13 = vld [vmem:[#allocation8 + $0x110] ss:$8 sps:$4 sm:$0xff]   ;;  %v3986_v15 = vld [vmem:[#allocation8 + $0x124] ss:$8 sps:$4 sm:$0xff]   ;;  %v3981_v16 = vld [vmem:[#allocation8 + $0x20] ss:$8 sps:$4 sm:$0xff]  }
  0x88   :  { %631 = vmatpush1.bf16.msra.mxu0 %v3909_v26  ;;  %v3984_v17 = vld [vmem:[#allocation8 + $0x120] ss:$8 sps:$4 sm:$0xff]   ;;  %v3989_v18 = vld [vmem:[#allocation8 + $0x34] ss:$8 sps:$4 sm:$0xff]   ;;  %v3987_v20 = vld [vmem:[#allocation8 + $0x30] ss:$8 sps:$4 sm:$0xff]  }
  0x89   :  { %672 = vmatpush1.bf16.msra.mxu1 %v3910_v27  ;;  %632 = vmatprep.subr.bf16.mxu0 %v3911_v28  ;;  %v3992_v19 = vld [vmem:[#allocation8 + $0x134] ss:$8 sps:$4 sm:$0xff]   ;;  %v3990_v21 = vld [vmem:[#allocation8 + $0x130] ss:$8 sps:$4 sm:$0xff]   ;;  %v3995_v22 = vld [vmem:[#allocation8 + $0x44] ss:$8 sps:$4 sm:$0xff]  }
  0x8a   :  { %673 = vmatprep.subr.bf16.mxu1 %v3913_v29  ;;  %v3998_v23 = vld [vmem:[#allocation8 + $0x144] ss:$8 sps:$4 sm:$0xff]   ;;  %v3993_v24 = vld [vmem:[#allocation8 + $0x40] ss:$8 sps:$4 sm:$0xff]   ;;  %v4001_v26 = vld [vmem:[#allocation8 + $0x54] ss:$8 sps:$4 sm:$0xff]  }
  0x8b   :  { %v3996_v25 = vld [vmem:[#allocation8 + $0x140] ss:$8 sps:$4 sm:$0xff]   ;;  %v4004_v27 = vld [vmem:[#allocation8 + $0x154] ss:$8 sps:$4 sm:$0xff]   ;;  %v3999_v28 = vld [vmem:[#allocation8 + $0x50] ss:$8 sps:$4 sm:$0xff]  }
  0x8c   :  { %633 = vmatpush1.bf16.msra.mxu0 %v3915_v30  ;;  %v4002_v29 = vld [vmem:[#allocation8 + $0x150] ss:$8 sps:$4 sm:$0xff]   ;;  %v4007_v30 = vld [vmem:[#allocation8 + $0x64] ss:$8 sps:$4 sm:$0xff]   ;;  %v4025_v46 = vld [vmem:[#allocation8 + $0x94] ss:$8 sps:$4 sm:$0xff]  }
  0x8d   :  { %674 = vmatpush1.bf16.msra.mxu1 %v3916_v31  ;;  %634 = vmatprep.subr.bf16.mxu0 %v3917_v32  ;;  %v4010_v31 = vld [vmem:[#allocation8 + $0x164] ss:$8 sps:$4 sm:$0xff]   ;;  %v4789_v32 = vld [vmem:[#allocation3] sm:$0xff]  ;;  %s3349_s2 = sshll.u32 %s4638_s19, 4  ;;  %s3350_s2 = int_to_ptr.vmem [resolvable:$true] %s3349_s2 }
  0x8e   :  { %675 = vmatprep.subr.bf16.mxu1 %v3919_v33  ;;  %v4791_v33 = vld [vmem:[#allocation3 + $0x8] sm:$0xff]  ;;  %v4028_v48 = vld [vmem:[#allocation8 + $0x194] ss:$8 sps:$4 sm:$0xff]   ;;  %s4594_s18 = scalar_lea.vmem %s3350_s2, 128  ;;  %p4599_p7 = scmp.lt.s32.totalorder %s3350_s2, %s3350_s2 }
  0x8f   :  { %p4595_p6 = scmp.ne.s32.totalorder %s3350_s2, %s4594_s18  ;;  %p4600_p8 = scmp.lt.s32.totalorder %s4594_s18, %s4594_s18 }
  0x90   :  { %635 = vmatpush1.bf16.msra.mxu0 %v3921_v34  ;;  %v4005_v34 = vld [vmem:[#allocation8 + $0x60] ss:$8 sps:$4 sm:$0xff]  }
  0x91   :  { %676 = vmatpush1.bf16.msra.mxu1 %v3922_v35  ;;  %636 = vmatprep.subr.bf16.mxu0 %v3923_v36  ;;  %v4008_v35 = vld [vmem:[#allocation8 + $0x160] ss:$8 sps:$4 sm:$0xff]   ;;  %v3430_v36 = vcombine.high %v4789_v32, %v4789_v32  ;;  %p4601_p9 = por %p4600_p8, %p4599_p7 }
  0x92   :  { %677 = vmatprep.subr.bf16.mxu1 %v3925_v37  ;;  %v3432_v37 = vcombine.high %v4791_v33, %v4791_v33 }
  0x93   :  { %p4602_p10 = pnand %p4601_p9, %p4595_p6 }
  0x94   :  { %637 = vmatpush1.bf16.msra.mxu0 %v3927_v38  ;;  %v4013_v38 = vld [vmem:[#allocation8 + $0x74] ss:$8 sps:$4 sm:$0xff]  }
  0x95   :  { %678 = vmatpush1.bf16.msra.mxu1 %v3928_v39  ;;  %638 = vmatprep.subr.bf16.mxu0 %v3929_v40  ;;  %v4016_v39 = vld [vmem:[#allocation8 + $0x174] ss:$8 sps:$4 sm:$0xff]   ;;  %v4011_v40 = vld [vmem:[#allocation8 + $0x70] ss:$8 sps:$4 sm:$0xff]  }
  0x96   :  { %679 = vmatprep.subr.bf16.mxu1 %v3931_v41  ;;  %v4014_v41 = vld [vmem:[#allocation8 + $0x170] ss:$8 sps:$4 sm:$0xff]  }
  0x98   :  { %639 = vmatpush1.bf16.msra.mxu0 %v3933_v42  ;;  %v4019_v42 = vld [vmem:[#allocation8 + $0x84] ss:$8 sps:$4 sm:$0xff]  }
  0x99   :  { %680 = vmatpush1.bf16.msra.mxu1 %v3934_v43  ;;  %640 = vmatprep.subr.bf16.mxu0 %v3935_v44  ;;  %v4022_v43 = vld [vmem:[#allocation8 + $0x184] ss:$8 sps:$4 sm:$0xff]   ;;  %v4017_v44 = vld [vmem:[#allocation8 + $0x80] ss:$8 sps:$4 sm:$0xff]  }
  0x9a   :  { %681 = vmatprep.subr.bf16.mxu1 %v3937_v45  ;;  %v4020_v45 = vld [vmem:[#allocation8 + $0x180] ss:$8 sps:$4 sm:$0xff]  }
  0x9c   :  { %641 = vmatpush1.bf16.msra.mxu0 %v3939_v49  ;;  %v4023_v49 = vld [vmem:[#allocation8 + $0x90] ss:$8 sps:$4 sm:$0xff]  }
  0x9d   :  { %682 = vmatpush1.bf16.msra.mxu1 %v3940_v50  ;;  %642 = vmatprep.subr.bf16.mxu0 %v3941_v52  ;;  %v4026_v50 = vld [vmem:[#allocation8 + $0x190] ss:$8 sps:$4 sm:$0xff]   ;;  %v4031_v52 = vld [vmem:[#allocation8 + $0xa4] ss:$8 sps:$4 sm:$0xff]  }
  0x9e   :  { %683 = vmatprep.subr.bf16.mxu1 %v3943_v53  ;;  %v4034_v53 = vld [vmem:[#allocation8 + $0x1a4] ss:$8 sps:$4 sm:$0xff]  }
  0xa0   :  { %643 = vmatpush1.bf16.msra.mxu0 %v3945_v54  ;;  %v4029_v54 = vld [vmem:[#allocation8 + $0xa0] ss:$8 sps:$4 sm:$0xff]  }
  0xa1   :  { %684 = vmatpush1.bf16.msra.mxu1 %v3946_v55  ;;  %644 = vmatprep.subr.bf16.mxu0 %v3947_v56  ;;  %v4032_v55 = vld [vmem:[#allocation8 + $0x1a0] ss:$8 sps:$4 sm:$0xff]   ;;  %v4037_v56 = vld [vmem:[#allocation8 + $0xb4] ss:$8 sps:$4 sm:$0xff]  }
  0xa2   :  { %685 = vmatprep.subr.bf16.mxu1 %v3949_v57  ;;  %v4040_v57 = vld [vmem:[#allocation8 + $0x1b4] ss:$8 sps:$4 sm:$0xff]  }
  0xa4   :  { %645 = vmatpush1.bf16.msra.mxu0 %v3951_v58  ;;  %v4035_v58 = vld [vmem:[#allocation8 + $0xb0] ss:$8 sps:$4 sm:$0xff]  }
  0xa5   :  { %686 = vmatpush1.bf16.msra.mxu1 %v3952_v59  ;;  %646 = vmatprep.subr.bf16.mxu0 %v3953_v60  ;;  %v4038_v59 = vld [vmem:[#allocation8 + $0x1b0] ss:$8 sps:$4 sm:$0xff]   ;;  %v4043_v60 = vld [vmem:[#allocation8 + $0xc4] ss:$8 sps:$4 sm:$0xff]  }
  0xa6   :  { %687 = vmatprep.subr.bf16.mxu1 %v3955_v61  ;;  %v4046_v61 = vld [vmem:[#allocation8 + $0x1c4] ss:$8 sps:$4 sm:$0xff]  }
  0xa8   :  { %647 = vmatpush1.bf16.msra.mxu0 %v3957_v62  ;;  %v4041_v62 = vld [vmem:[#allocation8 + $0xc0] ss:$8 sps:$4 sm:$0xff]  }
  0xa9   :  { %688 = vmatpush1.bf16.msra.mxu1 %v3958_v63  ;;  %648 = vmatprep.subr.bf16.mxu0 %v3959_v0  ;;  %v4044_v63 = vld [vmem:[#allocation8 + $0x1c0] ss:$8 sps:$4 sm:$0xff]   ;;  %v4049_v0 = vld [vmem:[#allocation8 + $0xd4] ss:$8 sps:$4 sm:$0xff]  }
  0xaa   :  { %689 = vmatprep.subr.bf16.mxu1 %v3961_v1  ;;  %v4052_v1 = vld [vmem:[#allocation8 + $0x1d4] ss:$8 sps:$4 sm:$0xff]  }
  0xac   :  { %649 = vmatpush1.bf16.msra.mxu0 %v3963_v2  ;;  %v4047_v2 = vld [vmem:[#allocation8 + $0xd0] ss:$8 sps:$4 sm:$0xff]  }
  0xad   :  { %690 = vmatpush1.bf16.msra.mxu1 %v3964_v3  ;;  %1201 = vmatprep.subr.bf16.mxu0 %v3971_v4  ;;  %v4050_v3 = vld [vmem:[#allocation8 + $0x1d0] ss:$8 sps:$4 sm:$0xff]   ;;  %v4055_v4 = vld [vmem:[#allocation8 + $0xe4] ss:$8 sps:$4 sm:$0xff]  }
  0xae   :  { %1242 = vmatprep.subr.bf16.mxu1 %v3974_v5  ;;  %v4058_v5 = vld [vmem:[#allocation8 + $0x1e4] ss:$8 sps:$4 sm:$0xff]  }
  0xaf   :  { %651 = vmatmul.mubr.bf16.vlgmr.msra.gmra.mrb[0].mxu0 %v4783_v6 }
  0xb0   :  { %692 = vmatmul.mubr.bf16.vlgmr.msra.gmra.mrb[0].mxu1 %v4785_v7  ;;  %1202 = vmatpush1.bf16.msra.mxu0 %v3969_v8  ;;  %v4053_v8 = vld [vmem:[#allocation8 + $0xe0] ss:$8 sps:$4 sm:$0xff]  }
  0xb1   :  { %1243 = vmatpush1.bf16.msra.mxu1 %v3972_v9  ;;  %1203 = vmatprep.subr.bf16.mxu0 %v3977_v10  ;;  %v4056_v9 = vld [vmem:[#allocation8 + $0x1e0] ss:$8 sps:$4 sm:$0xff]   ;;  %v4061_v10 = vld [vmem:[#allocation8 + $0xf4] ss:$8 sps:$4 sm:$0xff]  }
  0xb2   :  { %1244 = vmatprep.subr.bf16.mxu1 %v3980_v11  ;;  %1233 = vmatprep.mubr.bf16.mxu0 %v3430_v36  ;;  %v4064_v11 = vld [vmem:[#allocation8 + $0x1f4] ss:$8 sps:$4 sm:$0xff]   ;;  %v4093_v36 = vld [vmem:[#allocation8 + $0x240] ss:$8 sps:$4 sm:$0xff]  }
  0xb3   :  { %1274 = vmatprep.mubr.bf16.mxu1 %v3432_v37  ;;  %v4096_v37 = vld [vmem:[#allocation11 + $0xc0] ss:$24 sps:$4 sm:$0xff]  }
  0xb4   :  { %1204 = vmatpush1.bf16.msra.mxu0 %v3975_v12  ;;  %v4059_v12 = vld [vmem:[#allocation8 + $0xf0] ss:$8 sps:$4 sm:$0xff]  }
  0xb5   :  { %1245 = vmatpush1.bf16.msra.mxu1 %v3978_v13  ;;  %1205 = vmatprep.subr.bf16.mxu0 %v3983_v14  ;;  %v4062_v13 = vld [vmem:[#allocation8 + $0x1f0] ss:$8 sps:$4 sm:$0xff]   ;;  %v4070_v14 = vld [vmem:[#allocation8 + $0x204] ss:$8 sps:$4 sm:$0xff]  }
  0xb6   :  { %1246 = vmatprep.subr.bf16.mxu1 %v3986_v15  ;;  %v4073_v15 = vld [vmem:[#allocation11 + $0x4] ss:$24 sps:$4 sm:$0xff]  }
  0xb8   :  { %1206 = vmatpush1.bf16.msra.mxu0 %v3981_v16  ;;  %v3429_v16 = vcombine.low %v4789_v32, %v4789_v32  ;;  %v4087_v32 = vld [vmem:[#allocation8 + $0x230] ss:$8 sps:$4 sm:$0xff]  }
  0xb9   :  { %1247 = vmatpush1.bf16.msra.mxu1 %v3984_v17  ;;  %1207 = vmatprep.subr.bf16.mxu0 %v3989_v18  ;;  %v4068_v17 = vld [vmem:[#allocation8 + $0x200] ss:$8 sps:$4 sm:$0xff]  }
  0xba   :  { %1248 = vmatprep.subr.bf16.mxu1 %v3992_v19  ;;  %v4071_v18 = vld [vmem:[#allocation11] ss:$24 sps:$4 sm:$0xff]   ;;  %v3431_v19 = vcombine.low %v4791_v33, %v4791_v33  ;;  %v4090_v33 = vld [vmem:[#allocation11 + $0x90] ss:$24 sps:$4 sm:$0xff]  }
  0xbc   :  { %1208 = vmatpush1.bf16.msra.mxu0 %v3987_v20  ;;  %v4077_v20 = vld [vmem:[#allocation8 + $0x214] ss:$8 sps:$4 sm:$0xff]  }
  0xbd   :  { %1249 = vmatpush1.bf16.msra.mxu1 %v3990_v21  ;;  %1209 = vmatprep.subr.bf16.mxu0 %v3995_v22  ;;  %v4080_v21 = vld [vmem:[#allocation11 + $0x34] ss:$24 sps:$4 sm:$0xff]  }
  0xbe   :  { %1250 = vmatprep.subr.bf16.mxu1 %v3998_v23  ;;  %v4801_v22 = vld [vmem:[#allocation3 + $0x10] sm:$0xff] }
  0xbf   :  { %v3434_v23 = vcombine.high %v4801_v22, %v4801_v22 }
  0xc0   :  { %1210 = vmatpush1.bf16.msra.mxu0 %v3993_v24  ;;  %v4075_v24 = vld [vmem:[#allocation8 + $0x210] ss:$8 sps:$4 sm:$0xff]  }
  0xc1   :  { %1251 = vmatpush1.bf16.msra.mxu1 %v3996_v25  ;;  %1211 = vmatprep.subr.bf16.mxu0 %v4001_v26  ;;  %v4078_v25 = vld [vmem:[#allocation11 + $0x30] ss:$24 sps:$4 sm:$0xff]   ;;  %v4083_v26 = vld [vmem:[#allocation8 + $0x224] ss:$8 sps:$4 sm:$0xff]  }
  0xc2   :  { %1252 = vmatprep.subr.bf16.mxu1 %v4004_v27  ;;  %v4086_v27 = vld [vmem:[#allocation11 + $0x64] ss:$24 sps:$4 sm:$0xff]  }
  0xc4   :  { %1212 = vmatpush1.bf16.msra.mxu0 %v3999_v28  ;;  %v4081_v28 = vld [vmem:[#allocation8 + $0x220] ss:$8 sps:$4 sm:$0xff]  }
  0xc5   :  { %1253 = vmatpush1.bf16.msra.mxu1 %v4002_v29  ;;  %1213 = vmatprep.subr.bf16.mxu0 %v4007_v30  ;;  %v4084_v29 = vld [vmem:[#allocation11 + $0x60] ss:$24 sps:$4 sm:$0xff]   ;;  %v4089_v30 = vld [vmem:[#allocation8 + $0x234] ss:$8 sps:$4 sm:$0xff]  }
  0xc6   :  { %1254 = vmatprep.subr.bf16.mxu1 %v4010_v31  ;;  %v4092_v31 = vld [vmem:[#allocation11 + $0x94] ss:$24 sps:$4 sm:$0xff]  }
  0xc8   :  { %1214 = vmatpush1.bf16.msra.mxu0 %v4005_v34  ;;  %v4095_v34 = vld [vmem:[#allocation8 + $0x244] ss:$8 sps:$4 sm:$0xff]  }
  0xc9   :  { %1255 = vmatpush1.bf16.msra.mxu1 %v4008_v35  ;;  %1215 = vmatprep.subr.bf16.mxu0 %v4013_v38  ;;  %v4098_v35 = vld [vmem:[#allocation11 + $0xc4] ss:$24 sps:$4 sm:$0xff]  }
  0xca   :  { %1256 = vmatprep.subr.bf16.mxu1 %v4016_v39  ;;  %v4101_v38 = vld [vmem:[#allocation8 + $0x254] ss:$8 sps:$4 sm:$0xff]  }
  0xcb   :  { %v4104_v39 = vld [vmem:[#allocation11 + $0xf4] ss:$24 sps:$4 sm:$0xff]  }
  0xcc   :  { %1216 = vmatpush1.bf16.msra.mxu0 %v4011_v40  ;;  %v4099_v40 = vld [vmem:[#allocation8 + $0x250] ss:$8 sps:$4 sm:$0xff]  }
  0xcd   :  { %1257 = vmatpush1.bf16.msra.mxu1 %v4014_v41  ;;  %1217 = vmatprep.subr.bf16.mxu0 %v4019_v42  ;;  %v4102_v41 = vld [vmem:[#allocation11 + $0xf0] ss:$24 sps:$4 sm:$0xff]   ;;  %v4107_v42 = vld [vmem:[#allocation8 + $0x264] ss:$8 sps:$4 sm:$0xff]  }
  0xce   :  { %1258 = vmatprep.subr.bf16.mxu1 %v4022_v43  ;;  %v4110_v43 = vld [vmem:[#allocation11 + $0x124] ss:$24 sps:$4 sm:$0xff]  }
  0xd0   :  { %1218 = vmatpush1.bf16.msra.mxu0 %v4017_v44  ;;  %v4105_v44 = vld [vmem:[#allocation8 + $0x260] ss:$8 sps:$4 sm:$0xff]  }
  0xd1   :  { %1259 = vmatpush1.bf16.msra.mxu1 %v4020_v45  ;;  %1219 = vmatprep.subr.bf16.mxu0 %v4025_v46  ;;  %v4108_v45 = vld [vmem:[#allocation11 + $0x120] ss:$24 sps:$4 sm:$0xff]   ;;  %v4113_v46 = vld [vmem:[#allocation8 + $0x274] ss:$8 sps:$4 sm:$0xff]  }
  0xd2   :  { %1260 = vmatprep.subr.bf16.mxu1 %v4028_v48  ;;  %v4116_v48 = vld [vmem:[#allocation11 + $0x154] ss:$24 sps:$4 sm:$0xff]  }
  0xd4   :  { %1220 = vmatpush1.bf16.msra.mxu0 %v4023_v49  ;;  %v4111_v49 = vld [vmem:[#allocation8 + $0x270] ss:$8 sps:$4 sm:$0xff]  }
  0xd5   :  { %1261 = vmatpush1.bf16.msra.mxu1 %v4026_v50  ;;  %1221 = vmatprep.subr.bf16.mxu0 %v4031_v52  ;;  %v4114_v50 = vld [vmem:[#allocation11 + $0x150] ss:$24 sps:$4 sm:$0xff]   ;;  %v4119_v52 = vld [vmem:[#allocation8 + $0x284] ss:$8 sps:$4 sm:$0xff]  }
  0xd6   :  { %1262 = vmatprep.subr.bf16.mxu1 %v4034_v53  ;;  %v4122_v53 = vld [vmem:[#allocation11 + $0x184] ss:$24 sps:$4 sm:$0xff]  }
  0xd8   :  { %1222 = vmatpush1.bf16.msra.mxu0 %v4029_v54  ;;  %v4117_v54 = vld [vmem:[#allocation8 + $0x280] ss:$8 sps:$4 sm:$0xff]  }
  0xd9   :  { %1263 = vmatpush1.bf16.msra.mxu1 %v4032_v55  ;;  %1223 = vmatprep.subr.bf16.mxu0 %v4037_v56  ;;  %v4120_v55 = vld [vmem:[#allocation11 + $0x180] ss:$24 sps:$4 sm:$0xff]   ;;  %v4125_v56 = vld [vmem:[#allocation8 + $0x294] ss:$8 sps:$4 sm:$0xff]  }
  0xda   :  { %1264 = vmatprep.subr.bf16.mxu1 %v4040_v57  ;;  %v4128_v57 = vld [vmem:[#allocation11 + $0x1b4] ss:$24 sps:$4 sm:$0xff]  }
  0xdc   :  { %1224 = vmatpush1.bf16.msra.mxu0 %v4035_v58  ;;  %v4123_v58 = vld [vmem:[#allocation8 + $0x290] ss:$8 sps:$4 sm:$0xff]  }
  0xdd   :  { %1265 = vmatpush1.bf16.msra.mxu1 %v4038_v59  ;;  %1225 = vmatprep.subr.bf16.mxu0 %v4043_v60  ;;  %v4126_v59 = vld [vmem:[#allocation11 + $0x1b0] ss:$24 sps:$4 sm:$0xff]   ;;  %v4131_v60 = vld [vmem:[#allocation8 + $0x2a4] ss:$8 sps:$4 sm:$0xff]  }
  0xde   :  { %1266 = vmatprep.subr.bf16.mxu1 %v4046_v61  ;;  %v4134_v61 = vld [vmem:[#allocation11 + $0x1e4] ss:$24 sps:$4 sm:$0xff]  }
  0xe0   :  { %1226 = vmatpush1.bf16.msra.mxu0 %v4041_v62  ;;  %v4129_v62 = vld [vmem:[#allocation8 + $0x2a0] ss:$8 sps:$4 sm:$0xff]  }
  0xe1   :  { %1267 = vmatpush1.bf16.msra.mxu1 %v4044_v63  ;;  %1227 = vmatprep.subr.bf16.mxu0 %v4049_v0  ;;  %v4132_v63 = vld [vmem:[#allocation11 + $0x1e0] ss:$24 sps:$4 sm:$0xff]   ;;  %v4137_v0 = vld [vmem:[#allocation8 + $0x2b4] ss:$8 sps:$4 sm:$0xff]  }
  0xe2   :  { %1268 = vmatprep.subr.bf16.mxu1 %v4052_v1  ;;  %v4140_v1 = vld [vmem:[#allocation11 + $0x214] ss:$24 sps:$4 sm:$0xff]  }
  0xe4   :  { %1228 = vmatpush1.bf16.msra.mxu0 %v4047_v2  ;;  %v4135_v2 = vld [vmem:[#allocation8 + $0x2b0] ss:$8 sps:$4 sm:$0xff]  }
  0xe5   :  { %1269 = vmatpush1.bf16.msra.mxu1 %v4050_v3  ;;  %1229 = vmatprep.subr.bf16.mxu0 %v4055_v4  ;;  %v4138_v3 = vld [vmem:[#allocation11 + $0x210] ss:$24 sps:$4 sm:$0xff]   ;;  %v4143_v4 = vld [vmem:[#allocation8 + $0x2c4] ss:$8 sps:$4 sm:$0xff]  }
  0xe6   :  { %1270 = vmatprep.subr.bf16.mxu1 %v4058_v5  ;;  %v4146_v5 = vld [vmem:[#allocation11 + $0x244] ss:$24 sps:$4 sm:$0xff]  }
  0xe8   :  { %1230 = vmatpush1.bf16.msra.mxu0 %v4053_v8  ;;  %v4141_v8 = vld [vmem:[#allocation8 + $0x2c0] ss:$8 sps:$4 sm:$0xff]  }
  0xe9   :  { %1271 = vmatpush1.bf16.msra.mxu1 %v4056_v9  ;;  %1231 = vmatprep.subr.bf16.mxu0 %v4061_v10  ;;  %v4144_v9 = vld [vmem:[#allocation11 + $0x240] ss:$24 sps:$4 sm:$0xff]   ;;  %v4149_v10 = vld [vmem:[#allocation8 + $0x2d4] ss:$8 sps:$4 sm:$0xff]  }
  0xea   :  { %1272 = vmatprep.subr.bf16.mxu1 %v4064_v11  ;;  %v4152_v11 = vld [vmem:[#allocation11 + $0x274] ss:$24 sps:$4 sm:$0xff]  }
  0xec   :  { %1232 = vmatpush1.bf16.msra.mxu0 %v4059_v12  ;;  %v4147_v12 = vld [vmem:[#allocation8 + $0x2d0] ss:$8 sps:$4 sm:$0xff]  }
  0xed   :  { %1273 = vmatpush1.bf16.msra.mxu1 %v4062_v13  ;;  %1283 = vmatprep.subr.bf16.mxu0 %v4070_v14  ;;  %v4150_v13 = vld [vmem:[#allocation11 + $0x270] ss:$24 sps:$4 sm:$0xff]   ;;  %v4155_v14 = vld [vmem:[#allocation8 + $0x2e4] ss:$8 sps:$4 sm:$0xff]  }
  0xee   :  { %2549 = vmatprep.subr.bf16.mxu1 %v4073_v15  ;;  %v4158_v15 = vld [vmem:[#allocation11 + $0x2a4] ss:$24 sps:$4 sm:$0xff]  }
  0xef   :  { %1234 = vmatmul.mubr.bf16.vlgmr.msra.gmra.mrb[4].mxu0 %v3429_v16  ;;  %v4153_v16 = vld [vmem:[#allocation8 + $0x2e0] ss:$8 sps:$4 sm:$0xff]  }
  0xf0   :  { %1275 = vmatmul.mubr.bf16.vlgmr.msra.gmra.mrb[4].mxu1 %v3431_v19  ;;  %1284 = vmatpush1.bf16.msra.mxu0 %v4068_v17  ;;  %v4156_v17 = vld [vmem:[#allocation11 + $0x2a0] ss:$24 sps:$4 sm:$0xff]   ;;  %v4164_v19 = vld [vmem:[#allocation11 + $0x2d4] ss:$24 sps:$4 sm:$0xff]  }
  0xf1   :  { %2550 = vmatpush1.bf16.msra.mxu1 %v4071_v18  ;;  %1285 = vmatprep.subr.bf16.mxu0 %v4077_v20  ;;  %v4161_v18 = vld [vmem:[#allocation8 + $0x2f4] ss:$8 sps:$4 sm:$0xff]   ;;  %v4159_v20 = vld [vmem:[#allocation8 + $0x2f0] ss:$8 sps:$4 sm:$0xff]  }
  0xf2   :  { %2551 = vmatprep.subr.bf16.mxu1 %v4080_v21  ;;  %1315 = vmatprep.mubr.bf16.mxu0 %v3434_v23  ;;  %v4162_v21 = vld [vmem:[#allocation11 + $0x2d0] ss:$24 sps:$4 sm:$0xff]   ;;  %v4169_v23 = vld [vmem:[#allocation11 + $0x304] ss:$24 sps:$4 sm:$0xff]  }
  0xf3   :  { %2581 = vmatprep.mubr.bf16.mxu1 %v4777_v47 }
  0xf4   :  { %1286 = vmatpush1.bf16.msra.mxu0 %v4075_v24  ;;  %v4184_v24 = vld [vmem:[#allocation11 + $0xc] ss:$24 sps:$4 sm:$0xff]  }
  0xf5   :  { %2552 = vmatpush1.bf16.msra.mxu1 %v4078_v25  ;;  %1287 = vmatprep.subr.bf16.mxu0 %v4083_v26  ;;  %v3433_v25 = vcombine.low %v4801_v22, %v4801_v22  ;;  %v4167_v26 = vld [vmem:[#allocation11 + $0x300] ss:$24 sps:$4 sm:$0xff]  }
  0xf6   :  { %2553 = vmatprep.subr.bf16.mxu1 %v4086_v27  ;;  %v4182_v27 = vld [vmem:[#allocation11 + $0x8] ss:$24 sps:$4 sm:$0xff]  }
  0xf7   :  { %v4173_v22 = vld [vmem:[#allocation11 + $0x360] ss:$24 sps:$4 sm:$0xff]  }
  0xf8   :  { %1288 = vmatpush1.bf16.msra.mxu0 %v4081_v28  ;;  %v4172_v28 = vld [vmem:[#allocation11 + $0x334] ss:$24 sps:$4 sm:$0xff]  }
  0xf9   :  { %2554 = vmatpush1.bf16.msra.mxu1 %v4084_v29  ;;  %1289 = vmatprep.subr.bf16.mxu0 %v4089_v30  ;;  %v4190_v29 = vld [vmem:[#allocation11 + $0x3c] ss:$24 sps:$4 sm:$0xff]   ;;  %v4170_v30 = vld [vmem:[#allocation11 + $0x330] ss:$24 sps:$4 sm:$0xff]  }
  0xfa   :  { %2555 = vmatprep.subr.bf16.mxu1 %v4092_v31  ;;  %v4188_v31 = vld [vmem:[#allocation11 + $0x38] ss:$24 sps:$4 sm:$0xff]  }
  0xfc   :  { %1290 = vmatpush1.bf16.msra.mxu0 %v4087_v32  ;;  %v4175_v32 = vld [vmem:[#allocation11 + $0x364] ss:$24 sps:$4 sm:$0xff]  }
  0xfd   :  { %2556 = vmatpush1.bf16.msra.mxu1 %v4090_v33  ;;  %1291 = vmatprep.subr.bf16.mxu0 %v4095_v34  ;;  %v4196_v33 = vld [vmem:[#allocation11 + $0x6c] ss:$24 sps:$4 sm:$0xff]   ;;  %v4194_v34 = vld [vmem:[#allocation11 + $0x68] ss:$24 sps:$4 sm:$0xff]  }
  0xfe   :  { %2557 = vmatprep.subr.bf16.mxu1 %v4098_v35  ;;  %v4178_v35 = vld [vmem:[#allocation11 + $0x394] ss:$24 sps:$4 sm:$0xff]  }
 0x100   :  { %1292 = vmatpush1.bf16.msra.mxu0 %v4093_v36  ;;  %v4202_v36 = vld [vmem:[#allocation11 + $0x9c] ss:$24 sps:$4 sm:$0xff]  }
 0x101   :  { %2558 = vmatpush1.bf16.msra.mxu1 %v4096_v37  ;;  %1293 = vmatprep.subr.bf16.mxu0 %v4101_v38  ;;  %v4176_v37 = vld [vmem:[#allocation11 + $0x390] ss:$24 sps:$4 sm:$0xff]  }
 0x102   :  { %2559 = vmatprep.subr.bf16.mxu1 %v4104_v39  ;;  %v4200_v38 = vld [vmem:[#allocation11 + $0x98] ss:$24 sps:$4 sm:$0xff]   ;;  %v4181_v39 = vld [vmem:[#allocation11 + $0x3c4] ss:$24 sps:$4 sm:$0xff]  }
 0x104   :  { %1294 = vmatpush1.bf16.msra.mxu0 %v4099_v40  ;;  %v4208_v40 = vld [vmem:[#allocation11 + $0xcc] ss:$24 sps:$4 sm:$0xff]  }
 0x105   :  { %2560 = vmatpush1.bf16.msra.mxu1 %v4102_v41  ;;  %1295 = vmatprep.subr.bf16.mxu0 %v4107_v42  ;;  %v4179_v41 = vld [vmem:[#allocation11 + $0x3c0] ss:$24 sps:$4 sm:$0xff]  }
 0x106   :  { %2561 = vmatprep.subr.bf16.mxu1 %v4110_v43  ;;  %v4206_v42 = vld [vmem:[#allocation11 + $0xc8] ss:$24 sps:$4 sm:$0xff]   ;;  %v4187_v43 = vld [vmem:[#allocation11 + $0x3f4] ss:$24 sps:$4 sm:$0xff]  }
 0x108   :  { %1296 = vmatpush1.bf16.msra.mxu0 %v4105_v44  ;;  %v4214_v44 = vld [vmem:[#allocation11 + $0xfc] ss:$24 sps:$4 sm:$0xff]  }
 0x109   :  { %2562 = vmatpush1.bf16.msra.mxu1 %v4108_v45  ;;  %1297 = vmatprep.subr.bf16.mxu0 %v4113_v46  ;;  %v4185_v45 = vld [vmem:[#allocation11 + $0x3f0] ss:$24 sps:$4 sm:$0xff]  }
 0x10a   :  { %2563 = vmatprep.subr.bf16.mxu1 %v4116_v48  ;;  %v4212_v46 = vld [vmem:[#allocation11 + $0xf8] ss:$24 sps:$4 sm:$0xff]   ;;  %v4193_v48 = vld [vmem:[#allocation11 + $0x424] ss:$24 sps:$4 sm:$0xff]  }
 0x10c   :  { %1298 = vmatpush1.bf16.msra.mxu0 %v4111_v49  ;;  %v4220_v49 = vld [vmem:[#allocation11 + $0x12c] ss:$24 sps:$4 sm:$0xff]  }
 0x10d   :  { %2564 = vmatpush1.bf16.msra.mxu1 %v4114_v50  ;;  %1299 = vmatprep.subr.bf16.mxu0 %v4119_v52  ;;  %v4191_v50 = vld [vmem:[#allocation11 + $0x420] ss:$24 sps:$4 sm:$0xff]  }
 0x10e   :  { %2565 = vmatprep.subr.bf16.mxu1 %v4122_v53  ;;  %v4218_v52 = vld [vmem:[#allocation11 + $0x128] ss:$24 sps:$4 sm:$0xff]   ;;  %v4199_v53 = vld [vmem:[#allocation11 + $0x454] ss:$24 sps:$4 sm:$0xff]  }
 0x110   :  { %1300 = vmatpush1.bf16.msra.mxu0 %v4117_v54  ;;  %v4226_v54 = vld [vmem:[#allocation11 + $0x15c] ss:$24 sps:$4 sm:$0xff]  }
 0x111   :  { %2566 = vmatpush1.bf16.msra.mxu1 %v4120_v55  ;;  %1301 = vmatprep.subr.bf16.mxu0 %v4125_v56  ;;  %v4197_v55 = vld [vmem:[#allocation11 + $0x450] ss:$24 sps:$4 sm:$0xff]  }
 0x112   :  { %2567 = vmatprep.subr.bf16.mxu1 %v4128_v57  ;;  %v4224_v56 = vld [vmem:[#allocation11 + $0x158] ss:$24 sps:$4 sm:$0xff]   ;;  %v4205_v57 = vld [vmem:[#allocation11 + $0x484] ss:$24 sps:$4 sm:$0xff]  }
 0x114   :  { %1302 = vmatpush1.bf16.msra.mxu0 %v4123_v58  ;;  %v4232_v58 = vld [vmem:[#allocation11 + $0x18c] ss:$24 sps:$4 sm:$0xff]  }
 0x115   :  { %2568 = vmatpush1.bf16.msra.mxu1 %v4126_v59  ;;  %1303 = vmatprep.subr.bf16.mxu0 %v4131_v60  ;;  %v4203_v59 = vld [vmem:[#allocation11 + $0x480] ss:$24 sps:$4 sm:$0xff]  }
 0x116   :  { %2569 = vmatprep.subr.bf16.mxu1 %v4134_v61  ;;  %v4230_v60 = vld [vmem:[#allocation11 + $0x188] ss:$24 sps:$4 sm:$0xff]   ;;  %v4211_v61 = vld [vmem:[#allocation11 + $0x4b4] ss:$24 sps:$4 sm:$0xff]  }
 0x118   :  { %1304 = vmatpush1.bf16.msra.mxu0 %v4129_v62  ;;  %v4238_v62 = vld [vmem:[#allocation11 + $0x1bc] ss:$24 sps:$4 sm:$0xff]  }
 0x119   :  { %2570 = vmatpush1.bf16.msra.mxu1 %v4132_v63  ;;  %1305 = vmatprep.subr.bf16.mxu0 %v4137_v0  ;;  %v4209_v63 = vld [vmem:[#allocation11 + $0x4b0] ss:$24 sps:$4 sm:$0xff]   ;;  %v4217_v0 = vld [vmem:[#allocation11 + $0x4e4] ss:$24 sps:$4 sm:$0xff]  }
 0x11a   :  { %2571 = vmatprep.subr.bf16.mxu1 %v4140_v1  ;;  %v4236_v1 = vld [vmem:[#allocation11 + $0x1b8] ss:$24 sps:$4 sm:$0xff]  }
 0x11c   :  { %1306 = vmatpush1.bf16.msra.mxu0 %v4135_v2  ;;  %v4244_v2 = vld [vmem:[#allocation11 + $0x1ec] ss:$24 sps:$4 sm:$0xff]  }
 0x11d   :  { %2572 = vmatpush1.bf16.msra.mxu1 %v4138_v3  ;;  %1307 = vmatprep.subr.bf16.mxu0 %v4143_v4  ;;  %v4215_v3 = vld [vmem:[#allocation11 + $0x4e0] ss:$24 sps:$4 sm:$0xff]   ;;  %v4223_v4 = vld [vmem:[#allocation11 + $0x514] ss:$24 sps:$4 sm:$0xff]  }
 0x11e   :  { %2573 = vmatprep.subr.bf16.mxu1 %v4146_v5  ;;  %v4242_v5 = vld [vmem:[#allocation11 + $0x1e8] ss:$24 sps:$4 sm:$0xff]  }
 0x120   :  { %1308 = vmatpush1.bf16.msra.mxu0 %v4141_v8  ;;  %v4250_v8 = vld [vmem:[#allocation11 + $0x21c] ss:$24 sps:$4 sm:$0xff]  }
 0x121   :  { %2574 = vmatpush1.bf16.msra.mxu1 %v4144_v9  ;;  %1309 = vmatprep.subr.bf16.mxu0 %v4149_v10  ;;  %v4221_v9 = vld [vmem:[#allocation11 + $0x510] ss:$24 sps:$4 sm:$0xff]   ;;  %v4229_v10 = vld [vmem:[#allocation11 + $0x544] ss:$24 sps:$4 sm:$0xff]  }
 0x122   :  { %2575 = vmatprep.subr.bf16.mxu1 %v4152_v11  ;;  %v4248_v11 = vld [vmem:[#allocation11 + $0x218] ss:$24 sps:$4 sm:$0xff]  }
 0x124   :  { %1310 = vmatpush1.bf16.msra.mxu0 %v4147_v12  ;;  %v4253_v12 = vld [vmem:[#allocation11 + $0x24c] ss:$24 sps:$4 sm:$0xff]  }
 0x125   :  { %2576 = vmatpush1.bf16.msra.mxu1 %v4150_v13  ;;  %1311 = vmatprep.subr.bf16.mxu0 %v4155_v14  ;;  %v4227_v13 = vld [vmem:[#allocation11 + $0x540] ss:$24 sps:$4 sm:$0xff]   ;;  %v4235_v14 = vld [vmem:[#allocation11 + $0x574] ss:$24 sps:$4 sm:$0xff]  }
 0x126   :  { %2577 = vmatprep.subr.bf16.mxu1 %v4158_v15  ;;  %v4251_v15 = vld [vmem:[#allocation11 + $0x248] ss:$24 sps:$4 sm:$0xff]  }
 0x128   :  { %1312 = vmatpush1.bf16.msra.mxu0 %v4153_v16  ;;  %v4259_v16 = vld [vmem:[#allocation11 + $0x27c] ss:$24 sps:$4 sm:$0xff]  }
 0x129   :  { %2578 = vmatpush1.bf16.msra.mxu1 %v4156_v17  ;;  %1313 = vmatprep.subr.bf16.mxu0 %v4161_v18  ;;  %v4233_v17 = vld [vmem:[#allocation11 + $0x570] ss:$24 sps:$4 sm:$0xff]   ;;  %v4241_v18 = vld [vmem:[#allocation11 + $0x5a4] ss:$24 sps:$4 sm:$0xff]  }
 0x12a   :  { %2579 = vmatprep.subr.bf16.mxu1 %v4164_v19  ;;  %v4257_v19 = vld [vmem:[#allocation11 + $0x278] ss:$24 sps:$4 sm:$0xff]  }
 0x12c   :  { %1314 = vmatpush1.bf16.msra.mxu0 %v4159_v20  ;;  %v4265_v20 = vld [vmem:[#allocation11 + $0x2ac] ss:$24 sps:$4 sm:$0xff]  }
 0x12d   :  { %2580 = vmatpush1.bf16.msra.mxu1 %v4162_v21  ;;  %2631 = vmatprep.subr.bf16.mxu0 %v4184_v24  ;;  %v4239_v21 = vld [vmem:[#allocation11 + $0x5a0] ss:$24 sps:$4 sm:$0xff]  }
 0x12e   :  { %2590 = vmatprep.subr.bf16.mxu1 %v4169_v23  ;;  %v4247_v23 = vld [vmem:[#allocation11 + $0x5d4] ss:$24 sps:$4 sm:$0xff]   ;;  %v4263_v24 = vld [vmem:[#allocation11 + $0x2a8] ss:$24 sps:$4 sm:$0xff]  }
 0x12f   :  { %1316 = vmatmul.mubr.bf16.vlgmr.msra.gmra.mrb[8].mxu0 %v3433_v25  ;;  %v4271_v25 = vld [vmem:[#allocation11 + $0x2dc] ss:$24 sps:$4 sm:$0xff]  }
 0x130   :  { %2582 = vmatmul.mubr.bf16.vlgmr.msra.gmra.mrb[8].mxu1 %v4783_v6  ;;  %2632 = vmatpush1.bf16.msra.mxu0 %v4182_v27  ;;  %v4256_v27 = vld [vmem:[#allocation11 + $0x14] ss:$24 sps:$4 sm:$0xff]  }
 0x131   :  { %2591 = vmatpush1.bf16.msra.mxu1 %v4167_v26  ;;  %2633 = vmatprep.subr.bf16.mxu0 %v4190_v29  ;;  %v4245_v26 = vld [vmem:[#allocation11 + $0x5d0] ss:$24 sps:$4 sm:$0xff]   ;;  %v4277_v29 = vld [vmem:[#allocation11 + $0x30c] ss:$24 sps:$4 sm:$0xff]  }
 0x132   :  { %2592 = vmatprep.subr.bf16.mxu1 %v4172_v28  ;;  %2622 = vmatprep.mubr.bf16.mxu1 %v4779_v51  ;;  %v4269_v28 = vld [vmem:[#allocation11 + $0x2d8] ss:$24 sps:$4 sm:$0xff]  }
 0x133   :  { %2663 = vmatprep.mubr.bf16.mxu0 %v4777_v47 }
 0x134   :  { %2634 = vmatpush1.bf16.msra.mxu0 %v4188_v31  ;;  %v4275_v31 = vld [vmem:[#allocation11 + $0x308] ss:$24 sps:$4 sm:$0xff]  }
 0x135   :  { %2593 = vmatpush1.bf16.msra.mxu1 %v4170_v30  ;;  %2635 = vmatprep.subr.bf16.mxu0 %v4196_v33  ;;  %v4254_v30 = vld [vmem:[#allocation11 + $0x10] ss:$24 sps:$4 sm:$0xff]   ;;  %v4283_v33 = vld [vmem:[#allocation11 + $0x33c] ss:$24 sps:$4 sm:$0xff]  }
 0x136   :  { %2594 = vmatprep.subr.bf16.mxu1 %v4175_v32  ;;  %v4262_v32 = vld [vmem:[#allocation11 + $0x44] ss:$24 sps:$4 sm:$0xff]  }
 0x138   :  { %2636 = vmatpush1.bf16.msra.mxu0 %v4194_v34  ;;  %v4281_v34 = vld [vmem:[#allocation11 + $0x338] ss:$24 sps:$4 sm:$0xff]  }
 0x139   :  { %2595 = vmatpush1.bf16.msra.mxu1 %v4173_v22  ;;  %2637 = vmatprep.subr.bf16.mxu0 %v4202_v36  ;;  %v4260_v22 = vld [vmem:[#allocation11 + $0x40] ss:$24 sps:$4 sm:$0xff]   ;;  %v4289_v36 = vld [vmem:[#allocation11 + $0x36c] ss:$24 sps:$4 sm:$0xff]  }
 0x13a   :  { %2596 = vmatprep.subr.bf16.mxu1 %v4178_v35  ;;  %v4268_v35 = vld [vmem:[#allocation11 + $0x74] ss:$24 sps:$4 sm:$0xff]  }
 0x13c   :  { %2638 = vmatpush1.bf16.msra.mxu0 %v4200_v38  ;;  %v4287_v38 = vld [vmem:[#allocation11 + $0x368] ss:$24 sps:$4 sm:$0xff]  }
 0x13d   :  { %2597 = vmatpush1.bf16.msra.mxu1 %v4176_v37  ;;  %2639 = vmatprep.subr.bf16.mxu0 %v4208_v40  ;;  %v4266_v37 = vld [vmem:[#allocation11 + $0x70] ss:$24 sps:$4 sm:$0xff]   ;;  %v4295_v40 = vld [vmem:[#allocation11 + $0x39c] ss:$24 sps:$4 sm:$0xff]  }
 0x13e   :  { %2598 = vmatprep.subr.bf16.mxu1 %v4181_v39  ;;  %v4274_v39 = vld [vmem:[#allocation11 + $0xa4] ss:$24 sps:$4 sm:$0xff]  }
 0x140   :  { %2640 = vmatpush1.bf16.msra.mxu0 %v4206_v42  ;;  %v4293_v42 = vld [vmem:[#allocation11 + $0x398] ss:$24 sps:$4 sm:$0xff]  }
 0x141   :  { %2599 = vmatpush1.bf16.msra.mxu1 %v4179_v41  ;;  %2641 = vmatprep.subr.bf16.mxu0 %v4214_v44  ;;  %v4272_v41 = vld [vmem:[#allocation11 + $0xa0] ss:$24 sps:$4 sm:$0xff]   ;;  %v4301_v44 = vld [vmem:[#allocation11 + $0x3cc] ss:$24 sps:$4 sm:$0xff]  }
 0x142   :  { %2600 = vmatprep.subr.bf16.mxu1 %v4187_v43  ;;  %v4280_v43 = vld [vmem:[#allocation11 + $0xd4] ss:$24 sps:$4 sm:$0xff]  }
 0x144   :  { %2642 = vmatpush1.bf16.msra.mxu0 %v4212_v46  ;;  %v4286_v46 = vld [vmem:[#allocation11 + $0x104] ss:$24 sps:$4 sm:$0xff]  }
 0x145   :  { %2601 = vmatpush1.bf16.msra.mxu1 %v4185_v45  ;;  %2643 = vmatprep.subr.bf16.mxu0 %v4220_v49  ;;  %v4278_v45 = vld [vmem:[#allocation11 + $0xd0] ss:$24 sps:$4 sm:$0xff]   ;;  %v4284_v49 = vld [vmem:[#allocation11 + $0x100] ss:$24 sps:$4 sm:$0xff]  }
 0x146   :  { %2602 = vmatprep.subr.bf16.mxu1 %v4193_v48  ;;  %v4307_v48 = vld [vmem:[#allocation11 + $0x3fc] ss:$24 sps:$4 sm:$0xff]  }
 0x148   :  { %2644 = vmatpush1.bf16.msra.mxu0 %v4218_v52  ;;  %v4292_v52 = vld [vmem:[#allocation11 + $0x134] ss:$24 sps:$4 sm:$0xff]  }
 0x149   :  { %2603 = vmatpush1.bf16.msra.mxu1 %v4191_v50  ;;  %2645 = vmatprep.subr.bf16.mxu0 %v4226_v54  ;;  %v4305_v50 = vld [vmem:[#allocation11 + $0x3f8] ss:$24 sps:$4 sm:$0xff]  }
 0x14a   :  { %2604 = vmatprep.subr.bf16.mxu1 %v4199_v53  ;;  %v4313_v53 = vld [vmem:[#allocation11 + $0x42c] ss:$24 sps:$4 sm:$0xff]  }
 0x14c   :  { %2646 = vmatpush1.bf16.msra.mxu0 %v4224_v56 }
 0x14d   :  { %2605 = vmatpush1.bf16.msra.mxu1 %v4197_v55  ;;  %2647 = vmatprep.subr.bf16.mxu0 %v4232_v58 }
 0x14e   :  { %2606 = vmatprep.subr.bf16.mxu1 %v4205_v57 }
 0x150   :  { %2648 = vmatpush1.bf16.msra.mxu0 %v4230_v60 }
 0x151   :  { %2607 = vmatpush1.bf16.msra.mxu1 %v4203_v59  ;;  %2649 = vmatprep.subr.bf16.mxu0 %v4238_v62  ;;  %v4311_v62 = vld [vmem:[#allocation11 + $0x428] ss:$24 sps:$4 sm:$0xff]  }
 0x152   :  { %2608 = vmatprep.subr.bf16.mxu1 %v4211_v61  ;;  %v4290_v61 = vld [vmem:[#allocation11 + $0x130] ss:$24 sps:$4 sm:$0xff]  }
 0x154   :  { %2650 = vmatpush1.bf16.msra.mxu0 %v4236_v1  ;;  %v4298_v1 = vld [vmem:[#allocation11 + $0x164] ss:$24 sps:$4 sm:$0xff]  }
 0x155   :  { %2609 = vmatpush1.bf16.msra.mxu1 %v4209_v63  ;;  %2651 = vmatprep.subr.bf16.mxu0 %v4244_v2  ;;  %v4319_v2 = vld [vmem:[#allocation11 + $0x45c] ss:$24 sps:$4 sm:$0xff]  }
 0x156   :  { %2610 = vmatprep.subr.bf16.mxu1 %v4217_v0 }
 0x158   :  { %2652 = vmatpush1.bf16.msra.mxu0 %v4242_v5  ;;  %v4317_v5 = vld [vmem:[#allocation11 + $0x458] ss:$24 sps:$4 sm:$0xff]  }
 0x159   :  { %2611 = vmatpush1.bf16.msra.mxu1 %v4215_v3  ;;  %2653 = vmatprep.subr.bf16.mxu0 %v4250_v8  ;;  %v4304_v8 = vld [vmem:[#allocation11 + $0x194] ss:$24 sps:$4 sm:$0xff]  }
 0x15a   :  { %2612 = vmatprep.subr.bf16.mxu1 %v4223_v4  ;;  %v4296_v4 = vld [vmem:[#allocation11 + $0x160] ss:$24 sps:$4 sm:$0xff]  }
 0x15c   :  { %2654 = vmatpush1.bf16.msra.mxu0 %v4248_v11  ;;  %v4323_v11 = vld [vmem:[#allocation11 + $0x488] ss:$24 sps:$4 sm:$0xff]  }
 0x15d   :  { %2613 = vmatpush1.bf16.msra.mxu1 %v4221_v9  ;;  %2655 = vmatprep.subr.bf16.mxu0 %v4253_v12  ;;  %v4325_v9 = vld [vmem:[#allocation11 + $0x48c] ss:$24 sps:$4 sm:$0xff]  }
 0x15e   :  { %2614 = vmatprep.subr.bf16.mxu1 %v4229_v10  ;;  %v4302_v10 = vld [vmem:[#allocation11 + $0x190] ss:$24 sps:$4 sm:$0xff]   ;;  %v4310_v12 = vld [vmem:[#allocation11 + $0x1c4] ss:$24 sps:$4 sm:$0xff]  }
 0x160   :  { %2656 = vmatpush1.bf16.msra.mxu0 %v4251_v15  ;;  %v4329_v15 = vld [vmem:[#allocation11 + $0x4b8] ss:$24 sps:$4 sm:$0xff]  }
 0x161   :  { %2615 = vmatpush1.bf16.msra.mxu1 %v4227_v13  ;;  %2657 = vmatprep.subr.bf16.mxu0 %v4259_v16  ;;  %v4331_v13 = vld [vmem:[#allocation11 + $0x4bc] ss:$24 sps:$4 sm:$0xff]  }
 0x162   :  { %2616 = vmatprep.subr.bf16.mxu1 %v4235_v14  ;;  %v4308_v14 = vld [vmem:[#allocation11 + $0x1c0] ss:$24 sps:$4 sm:$0xff]   ;;  %v4316_v16 = vld [vmem:[#allocation11 + $0x1f4] ss:$24 sps:$4 sm:$0xff]  }
 0x164   :  { %2658 = vmatpush1.bf16.msra.mxu0 %v4257_v19  ;;  %v4335_v19 = vld [vmem:[#allocation11 + $0x4e8] ss:$24 sps:$4 sm:$0xff]  }
 0x165   :  { %2617 = vmatpush1.bf16.msra.mxu1 %v4233_v17  ;;  %2659 = vmatprep.subr.bf16.mxu0 %v4265_v20  ;;  %v4337_v17 = vld [vmem:[#allocation11 + $0x4ec] ss:$24 sps:$4 sm:$0xff]  }
 0x166   :  { %2618 = vmatprep.subr.bf16.mxu1 %v4241_v18  ;;  %v4314_v18 = vld [vmem:[#allocation11 + $0x1f0] ss:$24 sps:$4 sm:$0xff]   ;;  %v4322_v20 = vld [vmem:[#allocation11 + $0x224] ss:$24 sps:$4 sm:$0xff]  }
 0x168   :  { %2660 = vmatpush1.bf16.msra.mxu0 %v4263_v24  ;;  %v4341_v24 = vld [vmem:[#allocation11 + $0x518] ss:$24 sps:$4 sm:$0xff]  }
 0x169   :  { %2619 = vmatpush1.bf16.msra.mxu1 %v4239_v21  ;;  %2661 = vmatprep.subr.bf16.mxu0 %v4271_v25  ;;  %v4343_v21 = vld [vmem:[#allocation11 + $0x51c] ss:$24 sps:$4 sm:$0xff]  }
 0x16a   :  { %2620 = vmatprep.subr.bf16.mxu1 %v4247_v23  ;;  %v4320_v23 = vld [vmem:[#allocation11 + $0x220] ss:$24 sps:$4 sm:$0xff]   ;;  %v4328_v25 = vld [vmem:[#allocation11 + $0x254] ss:$24 sps:$4 sm:$0xff]  }
 0x16c   :  { %2662 = vmatpush1.bf16.msra.mxu0 %v4269_v28  ;;  %v4347_v28 = vld [vmem:[#allocation11 + $0x548] ss:$24 sps:$4 sm:$0xff]  }
 0x16d   :  { %2621 = vmatpush1.bf16.msra.mxu1 %v4245_v26  ;;  %2672 = vmatprep.subr.bf16.mxu0 %v4277_v29  ;;  %v4349_v26 = vld [vmem:[#allocation11 + $0x54c] ss:$24 sps:$4 sm:$0xff]  }
 0x16e   :  { %2713 = vmatprep.subr.bf16.mxu1 %v4256_v27  ;;  %v4326_v27 = vld [vmem:[#allocation11 + $0x250] ss:$24 sps:$4 sm:$0xff]   ;;  %v4334_v29 = vld [vmem:[#allocation11 + $0x284] ss:$24 sps:$4 sm:$0xff]  }
 0x16f   :  { %2664 = vmatmul.mubr.bf16.vlgmr.msra.gmra.mrb[12].mxu0 %v4783_v6 }
 0x170   :  { %2623 = vmatmul.mubr.bf16.vlgmr.msra.gmra.mrb[8].mxu1 %v4785_v7  ;;  %2673 = vmatpush1.bf16.msra.mxu0 %v4275_v31  ;;  %v4332_v31 = vld [vmem:[#allocation11 + $0x280] ss:$24 sps:$4 sm:$0xff]  }
 0x171   :  { %2714 = vmatpush1.bf16.msra.mxu1 %v4254_v30  ;;  %2674 = vmatprep.subr.bf16.mxu0 %v4283_v33  ;;  %v4355_v30 = vld [vmem:[#allocation11 + $0x57c] ss:$24 sps:$4 sm:$0xff]  }
 0x172   :  { %2715 = vmatprep.subr.bf16.mxu1 %v4262_v32  ;;  %2745 = vmatprep.mubr.bf16.mxu1 %v4777_v47  ;;  %v4299_v47 = vld [vmem:[#allocation11 + $0x3c8] ss:$24 sps:$4 sm:$0xff]   ;;  %v4353_v32 = vld [vmem:[#allocation11 + $0x578] ss:$24 sps:$4 sm:$0xff]   ;;  %v4340_v33 = vld [vmem:[#allocation11 + $0x2b4] ss:$24 sps:$4 sm:$0xff]  }
 0x173   :  { %2704 = vmatprep.mubr.bf16.mxu0 %v4779_v51 }
 0x174   :  { %2675 = vmatpush1.bf16.msra.mxu0 %v4281_v34  ;;  %v4338_v34 = vld [vmem:[#allocation11 + $0x2b0] ss:$24 sps:$4 sm:$0xff]  }
 0x175   :  { %2716 = vmatpush1.bf16.msra.mxu1 %v4260_v22  ;;  %2676 = vmatprep.subr.bf16.mxu0 %v4289_v36  ;;  %v4361_v22 = vld [vmem:[#allocation11 + $0x5ac] ss:$24 sps:$4 sm:$0xff]  }
 0x176   :  { %2717 = vmatprep.subr.bf16.mxu1 %v4268_v35  ;;  %v4359_v35 = vld [vmem:[#allocation11 + $0x5a8] ss:$24 sps:$4 sm:$0xff]   ;;  %v4346_v36 = vld [vmem:[#allocation11 + $0x2e4] ss:$24 sps:$4 sm:$0xff]  }
 0x178   :  { %2677 = vmatpush1.bf16.msra.mxu0 %v4287_v38  ;;  %v4344_v38 = vld [vmem:[#allocation11 + $0x2e0] ss:$24 sps:$4 sm:$0xff]  }
 0x179   :  { %2718 = vmatpush1.bf16.msra.mxu1 %v4266_v37  ;;  %2678 = vmatprep.subr.bf16.mxu0 %v4295_v40  ;;  %v4367_v37 = vld [vmem:[#allocation11 + $0x5dc] ss:$24 sps:$4 sm:$0xff]  }
 0x17a   :  { %2719 = vmatprep.subr.bf16.mxu1 %v4274_v39  ;;  %v4365_v39 = vld [vmem:[#allocation11 + $0x5d8] ss:$24 sps:$4 sm:$0xff]   ;;  %v4352_v40 = vld [vmem:[#allocation11 + $0x314] ss:$24 sps:$4 sm:$0xff]  }
 0x17c   :  { %2679 = vmatpush1.bf16.msra.mxu0 %v4293_v42  ;;  %v4358_v42 = vld [vmem:[#allocation11 + $0x344] ss:$24 sps:$4 sm:$0xff]  }
 0x17d   :  { %2720 = vmatpush1.bf16.msra.mxu1 %v4272_v41  ;;  %2680 = vmatprep.subr.bf16.mxu0 %v4301_v44  ;;  %v4350_v41 = vld [vmem:[#allocation11 + $0x310] ss:$24 sps:$4 sm:$0xff]   ;;  %v4364_v44 = vld [vmem:[#allocation11 + $0x374] ss:$24 sps:$4 sm:$0xff]  }
 0x17e   :  { %2721 = vmatprep.subr.bf16.mxu1 %v4280_v43  ;;  %v4356_v43 = vld [vmem:[#allocation11 + $0x340] ss:$24 sps:$4 sm:$0xff]  }
 0x180   :  { %2681 = vmatpush1.bf16.msra.mxu0 %v4299_v47  ;;  %v4370_v47 = vld [vmem:[#allocation11 + $0x3a4] ss:$24 sps:$4 sm:$0xff]  }
 0x181   :  { %2722 = vmatpush1.bf16.msra.mxu1 %v4278_v45  ;;  %2682 = vmatprep.subr.bf16.mxu0 %v4307_v48  ;;  %v4362_v45 = vld [vmem:[#allocation11 + $0x370] ss:$24 sps:$4 sm:$0xff]   ;;  %v4373_v48 = vld [vmem:[#allocation11 + $0x3d4] ss:$24 sps:$4 sm:$0xff]  }
 0x182   :  { %2723 = vmatprep.subr.bf16.mxu1 %v4286_v46  ;;  %v652_v54 = vpop.f32.mrb[0].mxu0  ;;  %v4368_v46 = vld [vmem:[#allocation11 + $0x3a0] ss:$24 sps:$4 sm:$0xff]  }
 0x183   :  { %v693_v55 = vpop.f32.mrb[0].mxu1  ;;  %v654_v57 = vpop.f32.mrb[1].mxu0 }
 0x184   :  { %v4815_v56 = vadd.f32 %v693_v55, %v652_v54  ;;  %v695_v58 = vpop.f32.mrb[1].mxu1  ;;  %v656_v60 = vpop.f32.mrb[2].mxu0  ;;  %2683 = vmatpush1.bf16.msra.mxu0 %v4305_v50  ;;  %v4374_v50 = vld [vmem:[#allocation11 + $0x400] ss:$24 sps:$4 sm:$0xff]  }
 0x185   :  { %v4817_v59 = vadd.f32 %v695_v58, %v654_v57  ;;  %2724 = vmatpush1.bf16.msra.mxu1 %v4284_v49  ;;  %v697_v63 = vpop.f32.mrb[2].mxu1  ;;  %v657_v0 = vpop.f32.mrb[3].mxu0  ;;  %2684 = vmatprep.subr.bf16.mxu0 %v4313_v53  ;;  %v4371_v49 = vld [vmem:[#allocation11 + $0x3d0] ss:$24 sps:$4 sm:$0xff]  }
 0x186   :  { %2725 = vmatprep.subr.bf16.mxu1 %v4292_v52  ;;  %v698_v3 = vpop.f32.mrb[3].mxu1  ;;  %v4379_v52 = vld [vmem:[#allocation11 + $0x434] ss:$24 sps:$4 sm:$0xff]  }
 0x188   :  { %2685 = vmatpush1.bf16.msra.mxu0 %v4311_v62 }
 0x189   :  { %2726 = vmatpush1.bf16.msra.mxu1 %v4290_v61  ;;  %2686 = vmatprep.subr.bf16.mxu0 %v4319_v2  ;;  %v4377_v61 = vld [vmem:[#allocation11 + $0x430] ss:$24 sps:$4 sm:$0xff]  }
 0x18a   :  { %2727 = vmatprep.subr.bf16.mxu1 %v4298_v1  ;;  %v4382_v1 = vld [vmem:[#allocation11 + $0x464] ss:$24 sps:$4 sm:$0xff]  }
 0x18c   :  { %2687 = vmatpush1.bf16.msra.mxu0 %v4317_v5  ;;  %v4385_v5 = vld [vmem:[#allocation11 + $0x494] ss:$24 sps:$4 sm:$0xff]  }
 0x18d   :  { %2728 = vmatpush1.bf16.msra.mxu1 %v4296_v4  ;;  %2688 = vmatprep.subr.bf16.mxu0 %v4325_v9  ;;  %v4380_v4 = vld [vmem:[#allocation11 + $0x460] ss:$24 sps:$4 sm:$0xff]   ;;  %v4391_v9 = vld [vmem:[#allocation11 + $0x4f4] ss:$24 sps:$4 sm:$0xff]  }
 0x18e   :  { %2729 = vmatprep.subr.bf16.mxu1 %v4304_v8  ;;  %v4388_v8 = vld [vmem:[#allocation11 + $0x4c4] ss:$24 sps:$4 sm:$0xff]  }
 0x190   :  { %2689 = vmatpush1.bf16.msra.mxu0 %v4323_v11  ;;  %v4394_v11 = vld [vmem:[#allocation11 + $0x524] ss:$24 sps:$4 sm:$0xff]  }
 0x191   :  { %2730 = vmatpush1.bf16.msra.mxu1 %v4302_v10  ;;  %2690 = vmatprep.subr.bf16.mxu0 %v4331_v13  ;;  %v4389_v10 = vld [vmem:[#allocation11 + $0x4f0] ss:$24 sps:$4 sm:$0xff]   ;;  %v4397_v13 = vld [vmem:[#allocation11 + $0x554] ss:$24 sps:$4 sm:$0xff]  }
 0x192   :  { %2731 = vmatprep.subr.bf16.mxu1 %v4310_v12  ;;  %v4392_v12 = vld [vmem:[#allocation11 + $0x520] ss:$24 sps:$4 sm:$0xff]  }
 0x194   :  { %2691 = vmatpush1.bf16.msra.mxu0 %v4329_v15  ;;  %v4400_v15 = vld [vmem:[#allocation11 + $0x584] ss:$24 sps:$4 sm:$0xff]  }
 0x195   :  { %2732 = vmatpush1.bf16.msra.mxu1 %v4308_v14  ;;  %2692 = vmatprep.subr.bf16.mxu0 %v4337_v17  ;;  %v4395_v14 = vld [vmem:[#allocation11 + $0x550] ss:$24 sps:$4 sm:$0xff]   ;;  %v4403_v17 = vld [vmem:[#allocation11 + $0x5b4] ss:$24 sps:$4 sm:$0xff]  }
 0x196   :  { %2733 = vmatprep.subr.bf16.mxu1 %v4316_v16  ;;  %v4398_v16 = vld [vmem:[#allocation11 + $0x580] ss:$24 sps:$4 sm:$0xff]  }
 0x198   :  { %2693 = vmatpush1.bf16.msra.mxu0 %v4335_v19  ;;  %v4406_v19 = vld [vmem:[#allocation11 + $0x5e4] ss:$24 sps:$4 sm:$0xff]  }
 0x199   :  { %2734 = vmatpush1.bf16.msra.mxu1 %v4314_v18  ;;  %2694 = vmatprep.subr.bf16.mxu0 %v4343_v21  ;;  %v4401_v18 = vld [vmem:[#allocation11 + $0x5b0] ss:$24 sps:$4 sm:$0xff]   ;;  %v1326_v21 = vlaneseq }
 0x19a   :  { %2735 = vmatprep.subr.bf16.mxu1 %v4322_v20  ;;  %v4404_v20 = vld [vmem:[#allocation11 + $0x5e0] ss:$24 sps:$4 sm:$0xff]  }
 0x19c   :  { %2695 = vmatpush1.bf16.msra.mxu0 %v4341_v24 }
 0x19d   :  { %2736 = vmatpush1.bf16.msra.mxu1 %v4320_v23  ;;  %2696 = vmatprep.subr.bf16.mxu0 %v4349_v26  ;;  %v4825_v23 = vshrl.u32 %v1326_v21, 7 }
 0x19e   :  { %2737 = vmatprep.subr.bf16.mxu1 %v4328_v25  ;;  %v1324_v25 = vld [vmem:[%s4878_s4] sm:$0x3] }
 0x19f   :  { %v1328_v24 = vsub.s32 0, %v4825_v23  ;;  %v1332_v26 = vsub.s32 1, %v4825_v23 }
 0x1a0   :  { %2697 = vmatpush1.bf16.msra.mxu0 %v4347_v28 }
 0x1a1   :  { %2738 = vmatpush1.bf16.msra.mxu1 %v4326_v27  ;;  %2698 = vmatprep.subr.bf16.mxu0 %v4355_v30  ;;  %v1329_v27 = vrot.slane %v1324_v25, %v1328_v24  ;;  %v1340_v30 = vld [vmem:[%s4879_s5] sm:$0x3] }
 0x1a2   :  { %2739 = vmatprep.subr.bf16.mxu1 %v4334_v29  ;;  %v1333_v29 = vrot.slane %v1324_v25, %v1332_v26  ;;  %v4460_v25 = vld [vmem:[#allocation3 + $0x8] sm:$0xff] }
 0x1a4   :  { %2699 = vmatpush1.bf16.msra.mxu0 %v4353_v32 }
 0x1a5   :  { %2740 = vmatpush1.bf16.msra.mxu1 %v4332_v31  ;;  %2700 = vmatprep.subr.bf16.mxu0 %v4361_v22 }
 0x1a6   :  { %2741 = vmatprep.subr.bf16.mxu1 %v4340_v33 }
 0x1a8   :  { %2701 = vmatpush1.bf16.msra.mxu0 %v4359_v35  ;;  %v1345_v35 = vrot.slane %v1340_v30, %v1328_v24 }
 0x1a9   :  { %2742 = vmatpush1.bf16.msra.mxu1 %v4338_v34  ;;  %2702 = vmatprep.subr.bf16.mxu0 %v4367_v37  ;;  %v1349_v37 = vrot.slane %v1340_v30, %v1332_v26 }
 0x1aa   :  { %2743 = vmatprep.subr.bf16.mxu1 %v4346_v36 }
 0x1ac   :  { %2703 = vmatpush1.bf16.msra.mxu0 %v4365_v39 }
 0x1ad   :  { %2744 = vmatpush1.bf16.msra.mxu1 %v4344_v38 }
 0x1ae   :  { %2754 = vmatprep.subr.bf16.mxu1 %v4352_v40 }
 0x1af   :  { %2705 = vmatmul.mubr.bf16.vlgmr.msra.gmra.mrb[12].mxu0 %v4785_v7 }
 0x1b0   :  { %2746 = vmatmul.mubr.bf16.vlgmr.msra.gmra.mrb[12].mxu1 %v4783_v6  ;;  %v4376_v6 = vld [vmem:[#allocation11 + $0x404] ss:$24 sps:$4 sm:$0xff]  }
 0x1b1   :  { %2755 = vmatpush1.bf16.msra.mxu1 %v4350_v41  ;;  %2786 = vmatprep.mubr.bf16.mxu1 %v4779_v51 }
 0x1b2   :  { %2756 = vmatprep.subr.bf16.mxu1 %v4358_v42 }
 0x1b5   :  { %2757 = vmatpush1.bf16.msra.mxu1 %v4356_v43  ;;  %v4407_v43 = vld [vmem:[#allocation12 + $0x40] sm:$0xff]  }
 0x1b6   :  { %2758 = vmatprep.subr.bf16.mxu1 %v4364_v44  ;;  %v4408_v44 = vld [vmem:[#allocation12] sm:$0xff]   ;;  %3772 = vmatprep.subr.bf16.mxu0 %v4407_v43  ;;  %v4461_v43 = vld [vmem:[#allocation3 + $0x10] sm:$0xff] }
 0x1b7   :  { %3773 = vmatpush3.bf16.msra.mxu0 %v4408_v44  ;;  %v2799_v44 = vunpack.c.l.bf16 %v4461_v43 }
 0x1b9   :  { %2759 = vmatpush1.bf16.msra.mxu1 %v4362_v45  ;;  %v4409_v45 = vld [vmem:[#allocation12 + $0x48] sm:$0xff]  }
 0x1ba   :  { %2760 = vmatprep.subr.bf16.mxu1 %v4370_v47  ;;  %v4410_v47 = vld [vmem:[#allocation12 + $0x8] sm:$0xff]   ;;  %3774 = vmatprep.subr.bf16.mxu0 %v4409_v45 }
 0x1bb   :  { %3775 = vmatpush3.bf16.msra.mxu0 %v4410_v47  ;;  %v4425_v45 = vld [vmem:[#allocation12 + $0xc8] sm:$0xff]  }
 0x1bd   :  { %2761 = vmatpush1.bf16.msra.mxu1 %v4368_v46  ;;  %v4411_v46 = vld [vmem:[#allocation12 + $0x50] sm:$0xff]  }
 0x1be   :  { %2762 = vmatprep.subr.bf16.mxu1 %v4373_v48  ;;  %v4412_v48 = vld [vmem:[#allocation12 + $0x10] sm:$0xff]   ;;  %3776 = vmatprep.subr.bf16.mxu0 %v4411_v46 }
 0x1bf   :  { %3777 = vmatpush3.bf16.msra.mxu0 %v4412_v48 }
 0x1c1   :  { %2763 = vmatpush1.bf16.msra.mxu1 %v4371_v49  ;;  %v4413_v49 = vld [vmem:[#allocation12 + $0x58] sm:$0xff]  }
 0x1c2   :  { %2764 = vmatprep.subr.bf16.mxu1 %v4376_v6  ;;  %v1235_v53 = vpop.f32.mrb[4].mxu0  ;;  %v4414_v6 = vld [vmem:[#allocation12 + $0x18] sm:$0xff]   ;;  %3778 = vmatprep.subr.bf16.mxu0 %v4413_v49 }
 0x1c3   :  { %v1276_v51 = vpop.f32.mrb[4].mxu1  ;;  %v1236_v54 = vadd.f32 %v1235_v53, %v4815_v56  ;;  %v1237_v55 = vpop.f32.mrb[5].mxu0  ;;  %v4383_v56 = vld [vmem:[#allocation11 + $0x490] ss:$24 sps:$4 sm:$0xff]   ;;  %3779 = vmatpush3.bf16.msra.mxu0 %v4414_v6 }
 0x1c4   :  { %v1278_v57 = vpop.f32.mrb[5].mxu1  ;;  %v1238_v58 = vadd.f32 %v1237_v55, %v4817_v59  ;;  %v1239_v60 = vpop.f32.mrb[6].mxu0  ;;  %v4386_v59 = vld [vmem:[#allocation11 + $0x4c0] ss:$24 sps:$4 sm:$0xff]   ;;  %v4417_v53 = vld [vmem:[#allocation12 + $0x68] sm:$0xff]   ;;  %v4420_v55 = vld [vmem:[#allocation12 + $0x30] sm:$0xff]  }
 0x1c5   :  { %2765 = vmatpush1.bf16.msra.mxu1 %v4374_v50  ;;  %v1280_v62 = vpop.f32.mrb[6].mxu1  ;;  %v1277_v63 = vadd.f32 %v1276_v51, %v1236_v54  ;;  %v1240_v0 = vpop.f32.mrb[7].mxu0  ;;  %v4415_v50 = vld [vmem:[#allocation12 + $0x60] sm:$0xff]   ;;  %v4418_v51 = vld [vmem:[#allocation12 + $0x28] sm:$0xff]   ;;  %v4419_v54 = vld [vmem:[#allocation12 + $0x70] sm:$0xff]  }
 0x1c6   :  { %2766 = vmatprep.subr.bf16.mxu1 %v4379_v52  ;;  %v1281_v2 = vpop.f32.mrb[7].mxu1  ;;  %v1279_v3 = vadd.f32 %v1278_v57, %v1238_v58  ;;  %v4416_v52 = vld [vmem:[#allocation12 + $0x20] sm:$0xff]   ;;  %3780 = vmatprep.subr.bf16.mxu0 %v4415_v50  ;;  %v4421_v57 = vld [vmem:[#allocation12 + $0x78] sm:$0xff]   ;;  %v4426_v50 = vld [vmem:[#allocation12 + $0x88] sm:$0xff]  }
 0x1c7   :  { %3781 = vmatpush3.bf16.msra.mxu0 %v4416_v52  ;;  %v4422_v58 = vld [vmem:[#allocation12 + $0x38] sm:$0xff]  }
 0x1c8   :  { %3782 = vmatprep.subr.bf16.mxu0 %v4417_v53  ;;  %v4838_v60 = vld [vmem:[%s4882_s8] sm:$0x3f] }
 0x1c9   :  { %2767 = vmatpush1.bf16.msra.mxu1 %v4377_v61  ;;  %v1562_v61 = vrot.slane %v4838_v60, %v1328_v24  ;;  %v1566_v62 = vrot.slane %v4838_v60, %v1332_v26  ;;  %v2798_v26 = vunpack.c.h.bf16 %v4460_v25 }
 0x1ca   :  { %2768 = vmatprep.subr.bf16.mxu1 %v4382_v1 }
 0x1cb   :  { %3783 = vmatpush3.bf16.msra.mxu0 %v4418_v51  ;;  %v4427_v51 = vld [vmem:[#allocation12 + $0xd0] sm:$0xff]  }
 0x1cc   :  { %3784 = vmatprep.subr.bf16.mxu0 %v4419_v54  ;;  %v1581_v54 = vsub.s32 5, %v4825_v23 }
 0x1cd   :  { %2769 = vmatpush1.bf16.msra.mxu1 %v4380_v4 }
 0x1ce   :  { %2770 = vmatprep.subr.bf16.mxu1 %v4385_v5 }
 0x1cf   :  { %3785 = vmatpush3.bf16.msra.mxu0 %v4420_v55  ;;  %v1569_v55 = vsub.s32 2, %v4825_v23 }
 0x1d0   :  { %3786 = vmatprep.subr.bf16.mxu0 %v4421_v57 }
 0x1d1   :  { %2771 = vmatpush1.bf16.msra.mxu1 %v4383_v56 }
 0x1d2   :  { %2772 = vmatprep.subr.bf16.mxu1 %v4388_v8 }
 0x1d3   :  { %3787 = vmatpush3.bf16.msra.mxu0 %v4422_v58  ;;  %v4428_v58 = vld [vmem:[#allocation12 + $0x90] sm:$0xff]  }
 0x1d5   :  { %2773 = vmatpush1.bf16.msra.mxu1 %v4386_v59 }
 0x1d6   :  { %2774 = vmatprep.subr.bf16.mxu1 %v4391_v9 }
 0x1d9   :  { %2775 = vmatpush1.bf16.msra.mxu1 %v4389_v10  ;;  %v1358_v10 = vstv %s4880_s6 }
 0x1da   :  { %2776 = vmatprep.subr.bf16.mxu1 %v4394_v11 }
 0x1dd   :  { %2777 = vmatpush1.bf16.msra.mxu1 %v4392_v12 }
 0x1de   :  { %2778 = vmatprep.subr.bf16.mxu1 %v4397_v13 }
 0x1e1   :  { %2779 = vmatpush1.bf16.msra.mxu1 %v4395_v14 }
 0x1e2   :  { %2780 = vmatprep.subr.bf16.mxu1 %v4400_v15 }
 0x1e5   :  { %2781 = vmatpush1.bf16.msra.mxu1 %v4398_v16  ;;  %v1573_v16 = vsub.s32 3, %v4825_v23 }
 0x1e6   :  { %2782 = vmatprep.subr.bf16.mxu1 %v4403_v17 }
 0x1e9   :  { %2783 = vmatpush1.bf16.msra.mxu1 %v4401_v18  ;;  %v1574_v18 = vrot.slane %v4838_v60, %v1573_v16 }
 0x1ea   :  { %2784 = vmatprep.subr.bf16.mxu1 %v4406_v19  ;;  %v4459_v19 = vld [vmem:[#allocation3] sm:$0xff] }
 0x1eb   :  { %v2796_v21 = vunpack.c.h.bf16 %v4459_v19 }
 0x1ed   :  { %2785 = vmatpush1.bf16.msra.mxu1 %v4404_v20  ;;  %v2795_v20 = vunpack.c.l.bf16 %v4459_v19  ;;  %v4439_v19 = vld [vmem:[#allocation12 + $0x140] sm:$0xff]  }
 0x1f0   :  { %2787 = vmatmul.mubr.bf16.vlgmr.msra.gmra.mrb[12].mxu1 %v4785_v7 }
 0x202   :  { %v1317_v28 = vpop.f32.mrb[8].mxu0 }
 0x203   :  { %v1318_v31 = vadd.f32 %v1317_v28, %v1277_v63  ;;  %v1319_v7 = vpop.f32.mrb[9].mxu0  ;;  %v4423_v63 = vld [vmem:[#allocation12 + $0xc0] sm:$0xff]  }
 0x204   :  { %v1320_v32 = vadd.f32 %v1319_v7, %v1279_v3  ;;  %v1321_v33 = vpop.f32.mrb[10].mxu0  ;;  %3794 = vmatprep.subr.bf16.mxu0 %v4423_v63  ;;  %v1582_v63 = vrot.slane %v4838_v60, %v1581_v54 }
 0x205   :  { %v1336_v22 = vadd.f32 %v1329_v27, %v1318_v31  ;;  %v1322_v34 = vpop.f32.mrb[11].mxu0  ;;  %v1577_v33 = vsub.s32 4, %v4825_v23  ;;  %v2797_v23 = vunpack.c.l.bf16 %v4460_v25  ;;  %v4441_v25 = vld [vmem:[#allocation12 + $0x148] sm:$0xff]  }
 0x206   :  { %v1337_v36 = vadd.f32 %v1333_v29, %v1320_v32 }
 0x207   :  { %v1338_v38 = vmax.f32 %v1336_v22, 0.0 }
 0x208   :  { %v1339_v39 = vmax.f32 %v1337_v36, 0.0 }
 0x209   :  { %v1352_v40 = vmul.f32 %v1345_v35, %v1338_v38 }
 0x20a   :  { %v1353_v41 = vmul.f32 %v1349_v37, %v1339_v39  ;;  %v1578_v39 = vrot.slane %v4838_v60, %v1577_v33  ;;  %v4449_v33 = vld [vmem:[#allocation12 + $0x168] sm:$0xff]  }
 0x20c   :  { %v1354_v42 = vadd.f32 %v1353_v41, %v1352_v40 }
 0x20e   :  { %1355 = vadd.xlane.f32.xlu0 %v1354_v42  ;;  %v4424_v42 = vld [vmem:[#allocation12 + $0x80] sm:$0xff]  }
 0x243   :  { %v2624_v0 = vpop.f32.mrb[8].mxu1 }
 0x244   :  { %v3838_v1 = vadd.f32 %v2624_v0, %v1562_v61  ;;  %v2626_v2 = vpop.f32.mrb[9].mxu1  ;;  %v1570_v0 = vrot.slane %v4838_v60, %v1569_v55 }
 0x245   :  { %v3839_v3 = vadd.f32 %v2626_v2, %v1566_v62  ;;  %v2628_v4 = vpop.f32.mrb[10].mxu1  ;;  %v4429_v62 = vld [vmem:[#allocation12 + $0xd8] sm:$0xff]   ;;  %v4431_v2 = vld [vmem:[#allocation12 + $0xe0] sm:$0xff]  }
 0x246   :  { %v2629_v5 = vpop.f32.mrb[11].mxu1  ;;  %v2801_v27 = vsub.f32 %v2795_v20, %v3838_v1  ;;  %v2800_v4 = vunpack.c.h.bf16 %v4461_v43 }
 0x247   :  { %v2802_v28 = vsub.f32 %v2796_v21, %v3839_v3  ;;  %v4440_v21 = vld [vmem:[#allocation12 + $0x100] sm:$0xff]  }
 0x282   :  { %v4842_v56 = vpop.f32.mrb[12].mxu0 }
 0x283   :  { %v2708_v8 = vpop.f32.mrb[13].mxu0  ;;  %v3840_v5 = vadd.f32 %v4842_v56, %v1570_v0  ;;  %v4438_v56 = vld [vmem:[#allocation12 + $0xb8] sm:$0xff]  }
 0x284   :  { %v2710_v59 = vpop.f32.mrb[14].mxu0  ;;  %v3841_v24 = vadd.f32 %v2708_v8, %v1574_v18  ;;  %v4432_v8 = vld [vmem:[#allocation12 + $0xa0] sm:$0xff]  }
 0x285   :  { %v2711_v9 = vpop.f32.mrb[15].mxu0  ;;  %v4433_v59 = vld [vmem:[#allocation12 + $0xe8] sm:$0xff]  }
 0x286   :  { %v2804_v29 = vsub.f32 %v2798_v26, %v3841_v24 }
 0x29b   :  { %v1356_v11 = vpop.xlane.xlu0 %1355 }
 0x29c   :  { %v1359_v12 = vadd.f32 %v1358_v10, %v1356_v11  ;;  %v2803_v10 = vsub.f32 %v2797_v23, %v3840_v5  ;;  %v4434_v11 = vld [vmem:[#allocation12 + $0xa8] sm:$0xff]  }
 0x29e   :  { %v1360_v13 = vsub.f32 0.0, %v1359_v12  ;;  %v4435_v12 = vld [vmem:[#allocation12 + $0xf0] sm:$0xff]  }
 0x2a0   :  { %v1361_v14 = vmul.f32 1.442695, %v1360_v13 }
 0x2a2   :  { %4455 = vpow2.f32 %v1361_v14  ;;  %v4436_v14 = vld [vmem:[#allocation12 + $0xb0] sm:$0xff]  }
 0x2ac   :  { %v4456_v15 = vpop.eup %4455 }
 0x2ad   :  { %v1363_v17 = vadd.f32 1.0, %v4456_v15  ;;  %v4437_v15 = vld [vmem:[#allocation12 + $0xf8] sm:$0xff]  }
 0x2af   :  { %4457 = vrcp.f32 %v1363_v17 }
 0x2b9   :  { %v4458_v30 = vpop.eup %4457 }
 0x2ba   :  { %v2808_v31 = vmul.f32 %v4458_v30, %v2802_v28  ;;  %v2807_v7 = vmul.f32 %v4458_v30, %v2801_v27  ;;  %v2810_v32 = vmul.f32 %v4458_v30, %v2804_v29  ;;  %v2809_v60 = vmul.f32 %v4458_v30, %v2803_v10  ;;  %v4442_v27 = vld [vmem:[#allocation12 + $0x108] sm:$0xff]   ;;  %v4443_v28 = vld [vmem:[#allocation12 + $0x150] sm:$0xff]  }
 0x2bb   :  { %v4444_v29 = vld [vmem:[#allocation12 + $0x110] sm:$0xff]  }
 0x2bc   :  { %v2814_v22 = vadd.f32 %v3839_v3, %v2808_v31  ;;  %v2813_v34 = vadd.f32 %v3838_v1, %v2807_v7  ;;  %v2816_v35 = vadd.f32 %v3841_v24, %v2810_v32  ;;  %v4430_v1 = vld [vmem:[#allocation12 + $0x98] sm:$0xff]   ;;  %v2815_v16 = vadd.f32 %v3840_v5, %v2809_v60  ;;  %v4447_v7 = vld [vmem:[#allocation12 + $0x160] sm:$0xff]  }
 0x2bd   :  { %v4446_v31 = vld [vmem:[#allocation12 + $0x118] sm:$0xff]   ;;  %v4448_v32 = vld [vmem:[#allocation12 + $0x120] sm:$0xff]  }
 0x2be   :  { %v2820_v36 = vmax.f32 %v2814_v22, 0.0  ;;  %v2819_v37 = vmax.f32 %v2813_v34, 0.0  ;;  %v2822_v38 = vmax.f32 %v2816_v35, 0.0  ;;  %v2821_v18 = vmax.f32 %v2815_v16, 0.0  ;;  %v4450_v22 = vld [vmem:[#allocation12 + $0x128] sm:$0xff]   ;;  %v4451_v34 = vld [vmem:[#allocation12 + $0x170] sm:$0xff]  }
 0x2bf   :  { %v4452_v35 = vld [vmem:[#allocation12 + $0x130] sm:$0xff]  }
 0x2c0   :  { %v2826_v40 = vpack.c.bf16 %v2820_v36, %v2820_v36  ;;  %v2825_v41 = vpack.c.bf16 %v2819_v37, %v2819_v37  ;;  %v2828_v46 = vpack.c.bf16 %v2822_v38, %v2822_v38  ;;  %v2827_v24 = vpack.c.bf16 %v2821_v18, %v2821_v18  ;;  %v4453_v36 = vld [vmem:[#allocation12 + $0x178] sm:$0xff]  }
 0x2c1   :  { %v4454_v37 = vld [vmem:[#allocation12 + $0x138] sm:$0xff]  }
 0x2c2   :  { %3254 = vmatprep.mubr.bf16.mxu0 %v2826_v40 }
 0x2c3   :  { %v2788_v47 = vpop.f32.mrb[12].mxu1  ;;  %3255 = vmatmul.mubr.bf16.vlgmr.msra.gmra.mrb[16].mxu0 %v2825_v41 }
 0x2c4   :  { %v3842_v48 = vadd.f32 %v2788_v47, %v1578_v39  ;;  %v2790_v49 = vpop.f32.mrb[13].mxu1  ;;  %3795 = vmatpush3.bf16.msra.mxu0 %v4424_v42  ;;  %3294 = vmatprep.mubr.bf16.mxu0 %v2828_v46 }
 0x2c5   :  { %v2792_v6 = vpop.f32.mrb[14].mxu1  ;;  %3796 = vmatprep.subr.bf16.mxu0 %v4425_v45  ;;  %v3843_v3 = vadd.f32 %v2790_v49, %v1582_v63  ;;  %v3723_v45 = vld [vmem:[%s4884_s10] ss:$0 sm:$0xff] }
 0x2c6   :  { %v2805_v52 = vsub.f32 %v2799_v44, %v3842_v48  ;;  %v2793_v53 = vpop.f32.mrb[15].mxu1 }
 0x2c7   :  { %v2806_v9 = vsub.f32 %v2800_v4, %v3843_v3 }
 0x2c8   :  { %v2811_v57 = vmul.f32 %v4458_v30, %v2805_v52  ;;  %3797 = vmatpush3.bf16.msra.mxu0 %v4426_v50 }
 0x2c9   :  { %3798 = vmatprep.subr.bf16.mxu0 %v4427_v51  ;;  %v2812_v13 = vmul.f32 %v4458_v30, %v2806_v9  ;;  %v4445_v30 = vld [vmem:[#allocation12 + $0x158] sm:$0xff]  }
 0x2ca   :  { %v4853_v61 = vadd.f32 %v3842_v48, %v2811_v57 }
 0x2cb   :  { %v2818_v17 = vadd.f32 %v3843_v3, %v2812_v13 }
 0x2cc   :  { %3799 = vmatpush3.bf16.msra.mxu0 %v4428_v58  ;;  %v2823_v38 = vmax.f32 %v4853_v61, 0.0 }
 0x2cd   :  { %3800 = vmatprep.subr.bf16.mxu0 %v4429_v62  ;;  %v2824_v20 = vmax.f32 %v2818_v17, 0.0 }
 0x2ce   :  { %v2829_v39 = vpack.c.bf16 %v2823_v38, %v2823_v38 }
 0x2cf   :  { %v2830_v26 = vpack.c.bf16 %v2824_v20, %v2824_v20 }
 0x2d0   :  { %3801 = vmatpush3.bf16.msra.mxu0 %v4430_v1 }
 0x2d1   :  { %3802 = vmatprep.subr.bf16.mxu0 %v4431_v2 }
 0x2d4   :  { %3803 = vmatpush3.bf16.msra.mxu0 %v4432_v8 }
 0x2d5   :  { %3804 = vmatprep.subr.bf16.mxu0 %v4433_v59 }
 0x2d8   :  { %3805 = vmatpush3.bf16.msra.mxu0 %v4434_v11 }
 0x2d9   :  { %3806 = vmatprep.subr.bf16.mxu0 %v4435_v12 }
 0x2dc   :  { %3807 = vmatpush3.bf16.msra.mxu0 %v4436_v14 }
 0x2dd   :  { %3808 = vmatprep.subr.bf16.mxu0 %v4437_v15 }
 0x2e0   :  { %3809 = vmatpush3.bf16.msra.mxu0 %v4438_v56 }
 0x2e1   :  { %3816 = vmatprep.subr.bf16.mxu0 %v4439_v19 }
 0x2e3   :  { %3295 = vmatmul.mubr.bf16.vlgmr.msra.gmra.mrb[20].mxu0 %v2827_v24 }
 0x2e4   :  { %3817 = vmatpush3.bf16.msra.mxu0 %v4440_v21  ;;  %3334 = vmatprep.mubr.bf16.mxu0 %v2830_v26 }
 0x2e5   :  { %3818 = vmatprep.subr.bf16.mxu0 %v4441_v25 }
 0x2e8   :  { %3819 = vmatpush3.bf16.msra.mxu0 %v4442_v27 }
 0x2e9   :  { %3820 = vmatprep.subr.bf16.mxu0 %v4443_v28 }
 0x2ec   :  { %3821 = vmatpush3.bf16.msra.mxu0 %v4444_v29 }
 0x2ed   :  { %3822 = vmatprep.subr.bf16.mxu0 %v4445_v30 }
 0x2f0   :  { %3823 = vmatpush3.bf16.msra.mxu0 %v4446_v31 }
 0x2f1   :  { %3824 = vmatprep.subr.bf16.mxu0 %v4447_v7 }
 0x2f4   :  { %3825 = vmatpush3.bf16.msra.mxu0 %v4448_v32 }
 0x2f5   :  { %3826 = vmatprep.subr.bf16.mxu0 %v4449_v33 }
 0x2f8   :  { %3827 = vmatpush3.bf16.msra.mxu0 %v4450_v22 }
 0x2f9   :  { %3828 = vmatprep.subr.bf16.mxu0 %v4451_v34 }
 0x2fc   :  { %3829 = vmatpush3.bf16.msra.mxu0 %v4452_v35 }
 0x2fd   :  { %3830 = vmatprep.subr.bf16.mxu0 %v4453_v36 }
 0x300   :  { %3831 = vmatpush3.bf16.msra.mxu0 %v4454_v37 }
 0x303   :  { %3335 = vmatmul.mubr.bf16.vlgmr.msra.gmra.mrb[24].mxu0 %v2829_v39 }
 0x396   :  { %v3788_v40 = vpop.f32.mrb[16].mxu0 }
 0x397   :  { %v3789_v41 = vpop.f32.mrb[17].mxu0 }
 0x398   :  { %v3790_v42 = vadd.f32 %v3789_v41, %v3788_v40  ;;  %v3791_v43 = vpop.f32.mrb[18].mxu0 }
 0x399   :  { %v3792_v44 = vpop.f32.mrb[19].mxu0 }
 0x39a   :  { %v3257_v48 = vadd.f32 %v3790_v42, %v3723_v45 }
 0x3b6   :  { %v3810_v47 = vpop.f32.mrb[20].mxu0 }
 0x3b7   :  { %v3811_v46 = vpop.f32.mrb[21].mxu0 }
 0x3b8   :  { %v3812_v49 = vadd.f32 %v3811_v46, %v3810_v47  ;;  %v3813_v6 = vpop.f32.mrb[22].mxu0 }
 0x3b9   :  { %v3814_v50 = vpop.f32.mrb[23].mxu0 }
 0x3ba   :  { %v3297_v52 = vadd.f32 %v3812_v49, %v3257_v48 }
 0x3d6   :  { %v3832_v53 = vpop.f32.mrb[24].mxu0 }
 0x3d7   :  { %v3833_v51 = vpop.f32.mrb[25].mxu0 }
 0x3d8   :  { %v3834_v54 = vadd.f32 %v3833_v51, %v3832_v53  ;;  %v3835_v55 = vpop.f32.mrb[26].mxu0 }
 0x3d9   :  { %v3836_v57 = vpop.f32.mrb[27].mxu0 }
 0x3da   :  { %v3337_v58 = vadd.f32 %v3834_v54, %v3297_v52 }
 0x3dc   :  { %3342 = vst [vmem:[#allocation14] sm:$0xff] %v3337_v58 }
 0x3dd   :  { %4605 = shalt.err (!%p4602_p10)
}
 0x3de   :  { %s4606_s17 = scalar_lea.hbm %s4885_s11, 128 }
 0x3df   :  { %p4607_p11 = scmp.ne.s32.totalorder %s4885_s11, %s4606_s17  ;;  %p4610_p12 = scmp.lt.u32.totalorder %s4606_s17, %s4885_s11 }
 0x3e1   :  { %p4612_p13 = pnand %p4610_p12, %p4607_p11 }
 0x3e3   :  { %4615 = shalt.err (!%p4612_p13)
}
 0x3e4   :  { %3352 = dma.vmem_to_hbm [thread:$0]  %s3350_s2, 128, %s4885_s11, [#allocation5]  }
 0x3e5   :  { %4624 = dma.done.wait [#allocation5], 128  }
 0x3e6   :  { %4625 = vsyncadd [#allocation5], 4294967168 }
 0x3e7   :  { %3356 = vsyncpa [#allocation4], 1 }
 0x3e8   :  { %3357 = vsyncpa [#allocation7], 1 }
 0x3e9   :  { %3358 = vsyncpa [#allocation10], 1 }
 0x3ea   :  { %3359 = vsyncpa [#allocation13], 1 }
 0x3eb   :  { %3360 = vsyncpa [#allocation5], 1 }

</bundles_post_ra>
